<compile_context>
chip_gen: v5e
topology: v5e:2x2
jax: 0.10.0
libtpu: 0.0.40
codegen_flags: <defaults>
</compile_context>

<pallas_src>
import math
from functools import partial

import numpy as np
import jax
import jax.numpy as jnp
from jax import lax
from jax.experimental import pallas as pl
from jax.experimental.pallas import tpu as pltpu

_EPS = 1e-5          # nn.LayerNorm default eps
_LEAKY_SLOPE = 0.01  # nn.LeakyReLU default negative_slope


def _layernorm_lanes(v, gamma, beta):
    # LayerNorm over the last (lane) axis
    mu = jnp.mean(v, axis=-1, keepdims=True)
    var = jnp.mean((v - mu) ** 2, axis=-1, keepdims=True)
    return (v - mu) * lax.rsqrt(var + _EPS) * gamma + beta


def _tree_reduce(vals, op):
    # pairwise tree: log2(P) dependent levels instead of a P-deep serial chain
    vals = list(vals)
    while len(vals) > 1:
        nxt = [op(vals[i], vals[i + 1]) for i in range(0, len(vals) - 1, 2)]
        if len(vals) % 2:
            nxt.append(vals[-1])
        vals = nxt
    return vals[0]


# --------------------------- the single fused kernel ---------------------------
def fused_encoder_kernel(xp_ref, sp_ref, xcf_ref, wagg_ref, g1_ref, b1_ref,
                         wqc_ref, wkc_ref, wv_ref,
                         cosq_ref, sinq_ref, cosk_ref, sink_ref,
                         uT_ref, w1aT_ref, w1bmT_ref, w2_ref, g2_ref, b2_ref,
                         o_ref, *, nhead, fast):
    cdt = jnp.bfloat16 if fast else jnp.float32
    f32 = jnp.float32

    def mm(a, b):          # standard matmul, fp32 accumulation
        return jnp.dot(a.astype(cdt), b.astype(cdt), preferred_element_type=f32)

    def mm_rT(a, b):       # a @ b^T (contract last dims of both — supported MXU form)
        return lax.dot_general(a.astype(cdt), b.astype(cdt),
                               (((1,), (1,)), ((), ())),
                               preferred_element_type=f32)

    # ---- stage 1: depthwise aggregate conv (kernel==stride) + LayerNorm -> query
    xp = xp_ref[0]                          # [P0, L0, C]
    wagg = wagg_ref[...]                    # [P0, C]
    terms = [xp[p] * wagg[p:p + 1, :] for p in range(xp.shape[0])]
    agg = _tree_reduce(terms, lambda a, b: a + b)
    g1, b1 = g1_ref[...], b1_ref[...]
    qn = _layernorm_lanes(agg, g1, b1)      # [L0, C]

    # ---- stage 2: max-pool (kernel==stride) + LayerNorm -> key/value source
    sp = sp_ref[0]                          # [P1, L1, C]
    pooled = _tree_reduce([sp[p] for p in range(sp.shape[0])], jnp.maximum)
    kvn = _layernorm_lanes(pooled, g1, b1)  # [L1, C]

    # ---- stage 3: projections (rotate_half folded into weights) + RoPE + MHA
    C = qn.shape[-1]
    q_all = mm(qn, wqc_ref[...])            # [L0, 2C] = [q | rotate_half(q)]
    k_all = mm(kvn, wkc_ref[...])           # [L1, 2C]
    v = mm(kvn, wv_ref[...])                # [L1, C]
    q = q_all[:, :C] * cosq_ref[...] + q_all[:, C:] * sinq_ref[...]
    k = k_all[:, :C] * cosk_ref[...] + k_all[:, C:] * sink_ref[...]

    dim = C // nhead
    scale = 1.0 / math.sqrt(dim)
    heads = []
    for h in range(nhead):                  # nhead is small & static
        sl = slice(h * dim, (h + 1) * dim)
        s = mm_rT(q[:, sl], k[:, sl]) * scale
        s = s - jnp.max(s, axis=-1, keepdims=True)
        e = jnp.exp(s)
        denom = jnp.sum(e, axis=-1, keepdims=True)
        if fast:
            a = e * pl.reciprocal(denom, approx=True)
        else:
            a = e / denom
        heads.append(mm(a, v[:, sl]))       # [L0, dim]
    o_heads = jnp.concatenate(heads, axis=-1)            # [L0, C]

    # ---- stage 4 (channel-major): merge folded into MLP, upsample, LN, residual
    xT = xcf_ref[0]                                      # [C, HW0]
    f_t = mm_rT(w1bmT_ref[...], o_heads)                 # [2C, L0]  = (W1_bot @ Wm) @ o^T
    hT = mm(w1aT_ref[...], xT) + mm(f_t, uT_ref[...])    # [2C, HW0]
    hT = jnp.where(hT >= 0, hT, _LEAKY_SLOPE * hT)
    h2T = mm(w2_ref[...], hT)                            # [C, HW0]
    mu = jnp.mean(h2T, axis=0, keepdims=True)            # LN over channel (sublane) axis
    var = jnp.mean((h2T - mu) ** 2, axis=0, keepdims=True)
    ln2 = (h2T - mu) * lax.rsqrt(var + _EPS) * g2_ref[...] + b2_ref[...]
    o_ref[0] = (xT + ln2).astype(o_ref.dtype)            # lane-dense [C, HW0] store


# ------------------------------- host-side buffers -------------------------------
def make_rope_tables(d_model, h, w, npe, ropefp16=True):
    trH, trW, teH, teW = [float(v) for v in npe]
    i_pos = (np.arange(1, h + 1, dtype=np.float32) * (trH / teH))[:, None, None]
    j_pos = (np.arange(1, w + 1, dtype=np.float32) * (trW / teW))[None, :, None]
    quarter = d_model // 4
    div = np.exp(np.arange(quarter, dtype=np.float32) *
                 (-math.log(10000.0) / quarter))[None, None, :]
    sin = np.zeros((h, w, d_model // 2), np.float32)
    cos = np.zeros((h, w, d_model // 2), np.float32)
    sin[:, :, 0::2] = np.sin(i_pos * div)
    sin[:, :, 1::2] = np.sin(j_pos * div)
    cos[:, :, 0::2] = np.cos(i_pos * div)
    cos[:, :, 1::2] = np.cos(j_pos * div)
    sin = np.repeat(sin, 2, axis=-1)
    cos = np.repeat(cos, 2, axis=-1)
    if ropefp16:  # module stores the tables in fp16; reproduce that rounding
        sin = sin.astype(np.float16).astype(np.float32)
        cos = cos.astype(np.float16).astype(np.float32)
    return cos.reshape(h * w, d_model), sin.reshape(h * w, d_model)


def bilinear_up_matrix(out_size, in_size, scale):
    # torch F.interpolate(mode='bilinear', align_corners=False) as a linear map
    A = np.zeros((out_size, in_size), np.float32)
    for o in range(out_size):
        src = max((o + 0.5) / scale - 0.5, 0.0)
        i0 = min(int(math.floor(src)), in_size - 1)
        i1 = min(i0 + 1, in_size - 1)
        lam = src - i0
        A[o, i0] += 1.0 - lam
        A[o, i1] += lam
    return A


def _rot_cols(w_t):
    """Exact w_t @ P (P = rotate_half pairing matrix) via column permute + negate."""
    cin, cout = w_t.shape
    wl = w_t.reshape(cin, cout // 2, 2)
    return jnp.stack([-wl[..., 1], wl[..., 0]], axis=-1).reshape(cin, cout)


# ------------------------------------ wrapper ------------------------------------
@partial(jax.jit, static_argnames=("nhead", "agg0", "agg1", "rope", "fast"))
def ag_rope_encoder_layer(x, source, params, *, nhead, agg0, agg1, rope=True,
                          fast=True):
    N, C, H0, W0 = x.shape
    H1, W1 = source.shape[2], source.shape[3]
    h0, w0 = H0 // agg0, W0 // agg0
    h1, w1 = H1 // agg1, W1 // agg1
    L0, L1 = h0 * w0, h1 * w1
    P0, P1 = agg0 * agg0, agg1 * agg1
    HW0 = H0 * W0
    f32 = jnp.float32
    wdt = jnp.bfloat16 if fast else f32     # MXU-operand dtype for weights

    # channel-last + patch extraction (kernel==stride windows).
    # TODO(synk): at production shapes read patches in-kernel with strided ds
    # from the raw NHWC tensor to avoid this extra XLA relayout pass.
    x_nhwc = jnp.transpose(x, (0, 2, 3, 1)).astype(f32)
    s_nhwc = jnp.transpose(source, (0, 2, 3, 1)).astype(f32)
    xp = (x_nhwc.reshape(N, h0, agg0, w0, agg0, C)
          .transpose(0, 2, 4, 1, 3, 5).reshape(N, P0, L0, C))
    sp = (s_nhwc.reshape(N, h1, agg1, w1, agg1, C)
          .transpose(0, 2, 4, 1, 3, 5).reshape(N, P1, L1, C))
    x_cf = x.astype(f32).reshape(N, C, HW0)            # channel-major, free reshape

    w_agg_pc = jnp.transpose(params['w_agg'], (1, 2, 0)).reshape(P0, C)
    g1 = params['gamma1'].reshape(1, C); b1 = params['beta1'].reshape(1, C)
    g2 = params['gamma2'].reshape(C, 1); b2 = params['beta2'].reshape(C, 1)

    wq_t, wk_t = params['wq'].T, params['wk'].T
    if rope:
        wq_cat = jnp.concatenate([wq_t, _rot_cols(wq_t)], axis=1)   # [C, 2C]
        wk_cat = jnp.concatenate([wk_t, _rot_cols(wk_t)], axis=1)
        cos_q, sin_q = params['cos_q'], params['sin_q']
        cos_k, sin_k = params['cos_k'], params['sin_k']
    else:
        wq_cat = jnp.concatenate([wq_t, jnp.zeros_like(wq_t)], axis=1)
        wk_cat = jnp.concatenate([wk_t, jnp.zeros_like(wk_t)], axis=1)
        cos_q = jnp.ones((L0, C), f32); sin_q = jnp.zeros((L0, C), f32)
        cos_k = jnp.ones((L1, C), f32); sin_k = jnp.zeros((L1, C), f32)

    # MXU-only operands (pre-cast so they are also DMA'd narrow when fast)
    wq_cat = wq_cat.astype(wdt); wk_cat = wk_cat.astype(wdt)
    wv_t = params['wv'].T.astype(wdt)

    w1 = params['w_mlp1']                               # [2C, 2C]
    w1aT = w1[:, :C].astype(wdt)                        # multiplies x^T   [2C, C]
    # fold the merge projection into the "up" half of the MLP first layer
    w1bmT = jnp.dot(w1[:, C:], params['wm'],
                    precision=lax.Precision.HIGHEST).astype(wdt)   # [2C, C]
    w2 = params['w_mlp2'].astype(wdt)                   # [C, 2C]
    # TODO(synk): at production shapes use the separable A_h/A_w form instead of
    # the dense kron upsample matrix.
    UT = params['upsample'].T.astype(wdt)               # [L0, HW0]

    const2 = lambda n: (0, 0)
    out_cf = pl.pallas_call(
        partial(fused_encoder_kernel, nhead=nhead, fast=fast),
        out_shape=jax.ShapeDtypeStruct((N, C, HW0), f32),
        grid=(N,),
        in_specs=[
            pl.BlockSpec((1, P0, L0, C), lambda n: (n, 0, 0, 0)),   # xp
            pl.BlockSpec((1, P1, L1, C), lambda n: (n, 0, 0, 0)),   # sp
            pl.BlockSpec((1, C, HW0), lambda n: (n, 0, 0)),         # x channel-major
            pl.BlockSpec((P0, C), const2),                          # w_agg
            pl.BlockSpec((1, C), const2),                           # gamma1
            pl.BlockSpec((1, C), const2),                           # beta1
            pl.BlockSpec((C, 2 * C), const2),                       # wq_cat
            pl.BlockSpec((C, 2 * C), const2),                       # wk_cat
            pl.BlockSpec((C, C), const2),                           # wv
            pl.BlockSpec((L0, C), const2),                          # cos_q
            pl.BlockSpec((L0, C), const2),                          # sin_q
            pl.BlockSpec((L1, C), const2),                          # cos_k
            pl.BlockSpec((L1, C), const2),                          # sin_k
            pl.BlockSpec((L0, HW0), const2),                        # U^T
            pl.BlockSpec((2 * C, C), const2),                       # w1 top (for x)
            pl.BlockSpec((2 * C, C), const2),                       # w1 bottom @ Wm
            pl.BlockSpec((C, 2 * C), const2),                       # w2
            pl.BlockSpec((C, 1), const2),                           # gamma2
            pl.BlockSpec((C, 1), const2),                           # beta2
        ],
        out_specs=pl.BlockSpec((1, C, HW0), lambda n: (n, 0, 0)),
        compiler_params=pltpu.CompilerParams(
            dimension_semantics=("parallel",)),
    )(xp, sp, x_cf, w_agg_pc, g1, b1, wq_cat, wk_cat, wv_t,
      cos_q, sin_q, cos_k, sin_k, UT, w1aT, w1bmT, w2, g2, b2)

    # output is already channel-major -> NCHW is a free reshape (no XLA transpose)
    return out_cf.reshape(N, C, H0, W0)


# ------------------------------ pure-JAX reference ------------------------------
def reference_forward(x, source, params, *, nhead, agg0, agg1, rope=True):
    N, C, H0, W0 = x.shape
    H1, W1 = source.shape[2], source.shape[3]
    h0, w0, h1, w1 = H0 // agg0, W0 // agg0, H1 // agg1, W1 // agg1
    L0, L1, HW0 = h0 * w0, h1 * w1, H0 * W0

    x_nhwc = jnp.transpose(x, (0, 2, 3, 1))
    s_nhwc = jnp.transpose(source, (0, 2, 3, 1))
    w_sp = jnp.transpose(params['w_agg'], (1, 2, 0))
    agg = jnp.einsum('niajbc,abc->nijc',
                     x_nhwc.reshape(N, h0, agg0, w0, agg0, C), w_sp)
    pooled = jnp.max(s_nhwc.reshape(N, h1, agg1, w1, agg1, C), axis=(2, 4))

    def ln(v, g, b):
        mu = jnp.mean(v, -1, keepdims=True)
        var = jnp.mean((v - mu) ** 2, -1, keepdims=True)
        return (v - mu) / jnp.sqrt(var + _EPS) * g + b

    qn = ln(agg, params['gamma1'], params['beta1']).reshape(N, L0, C)
    kvn = ln(pooled, params['gamma1'], params['beta1']).reshape(N, L1, C)
    q, k, v = qn @ params['wq'].T, kvn @ params['wk'].T, kvn @ params['wv'].T
    if rope:
        def rot_half(t):
            t2 = t.reshape(*t.shape[:-1], C // 2, 2)
            return jnp.stack([-t2[..., 1], t2[..., 0]], axis=-1).reshape(t.shape)
        q = q * params['cos_q'][None] + rot_half(q) * params['sin_q'][None]
        k = k * params['cos_k'][None] + rot_half(k) * params['sin_k'][None]
    dim = C // nhead
    qh = q.reshape(N, L0, nhead, dim).transpose(0, 2, 1, 3)
    kh = k.reshape(N, L1, nhead, dim).transpose(0, 2, 1, 3)
    vh = v.reshape(N, L1, nhead, dim).transpose(0, 2, 1, 3)
    s = jnp.einsum('nhld,nhsd->nhls', qh, kh) / math.sqrt(dim)
    a = jax.nn.softmax(s, axis=-1)
    o = jnp.einsum('nhls,nhsd->nhld', a, vh).transpose(0, 2, 1, 3).reshape(N, L0, C)
    m = o @ params['wm'].T
    up = jnp.einsum('pl,nlc->npc', params['upsample'], m)
    cat = jnp.concatenate([x_nhwc.reshape(N, HW0, C), up], axis=-1)
    hmid = cat @ params['w_mlp1'].T
    hmid = jnp.where(hmid >= 0, hmid, _LEAKY_SLOPE * hmid)
    h2 = hmid @ params['w_mlp2'].T
    out = x_nhwc.reshape(N, HW0, C) + ln(h2, params['gamma2'], params['beta2'])
    return out.reshape(N, H0, W0, C).transpose(0, 3, 1, 2)


# ---------------------------------------- main ----------------------------------------
if __name__ == "__main__":
    N, C, H0, W0 = 2, 32, 16, 16       # d_model=32
    H1, W1 = 16, 16
    nhead, agg0, agg1 = 4, 4, 4
    rope = True
    npe = (float(H0), float(W0), float(H0), float(W0))

    key = jax.random.PRNGKey(0)
    kx, ksrc, *kp = jax.random.split(key, 13)
    x = jax.random.normal(kx, (N, C, H0, W0), jnp.float32)
    source = jax.random.normal(ksrc, (N, C, H1, W1), jnp.float32)

    def lin(k, out_f, in_f):
        bound = 1.0 / math.sqrt(in_f)
        return jax.random.uniform(k, (out_f, in_f), jnp.float32, -bound, bound)

    h0, w0 = H0 // agg0, W0 // agg0
    h1, w1 = H1 // agg1, W1 // agg1
    params = {
        'w_agg': jax.random.uniform(kp[0], (C, agg0, agg0), jnp.float32,
                                    -1.0 / agg0, 1.0 / agg0),
        'wq': lin(kp[1], C, C), 'wk': lin(kp[2], C, C),
        'wv': lin(kp[3], C, C), 'wm': lin(kp[4], C, C),
        'w_mlp1': lin(kp[5], 2 * C, 2 * C), 'w_mlp2': lin(kp[6], C, 2 * C),
        'gamma1': 1.0 + 0.1 * jax.random.normal(kp[7], (C,), jnp.float32),
        'beta1': 0.1 * jax.random.normal(kp[8], (C,), jnp.float32),
        'gamma2': 1.0 + 0.1 * jax.random.normal(kp[9], (C,), jnp.float32),
        'beta2': 0.1 * jax.random.normal(kp[10], (C,), jnp.float32),
    }
    cos_q, sin_q = make_rope_tables(C, h0, w0, npe)
    cos_k, sin_k = make_rope_tables(C, h1, w1, npe)
    params['cos_q'], params['sin_q'] = jnp.asarray(cos_q), jnp.asarray(sin_q)
    params['cos_k'], params['sin_k'] = jnp.asarray(cos_k), jnp.asarray(sin_k)
    A_h = bilinear_up_matrix(H0, h0, agg0)
    A_w = bilinear_up_matrix(W0, w0, agg0)
    params['upsample'] = jnp.asarray(np.kron(A_h, A_w))   # [H0*W0, h0*w0]

    # accurate-f32 reference (force full-precision matmuls in XLA)
    with jax.default_matmul_precision("float32"):
        ref = jax.block_until_ready(
            reference_forward(x, source, params,
                              nhead=nhead, agg0=agg0, agg1=agg1, rope=rope))

    # 1) exact fp32 path: tight tolerance (catches layout / indexing bugs)
    out_exact = jax.block_until_ready(
        ag_rope_encoder_layer(x, source, params, nhead=nhead, agg0=agg0,
                              agg1=agg1, rope=rope, fast=False))
    np.testing.assert_allclose(np.asarray(out_exact), np.asarray(ref),
                               rtol=2e-3, atol=2e-3)

    # 2) fast path: bf16 MXU operands + approx softmax reciprocal (v6e/v7x mode)
    out_fast = jax.block_until_ready(
        ag_rope_encoder_layer(x, source, params, nhead=nhead, agg0=agg0,
                              agg1=agg1, rope=rope, fast=True))
    np.testing.assert_allclose(np.asarray(out_fast), np.asarray(ref),
                               rtol=1e-1, atol=1e-1)

    print("KERNEL_OK")
</pallas_src>

<mosaic_0001>
module attributes {stable_mosaic.version = 11 : i64} {
  func.func @fused_encoder_kernel(%arg0: i32, %arg1: memref<1x16x16x32xf32, #tpu.memory_space<vmem>>, %arg2: memref<1x16x16x32xf32, #tpu.memory_space<vmem>>, %arg3: memref<1x32x256xf32, #tpu.memory_space<vmem>>, %arg4: memref<16x32xf32, #tpu.memory_space<vmem>>, %arg5: memref<1x32xf32, #tpu.memory_space<vmem>>, %arg6: memref<1x32xf32, #tpu.memory_space<vmem>>, %arg7: memref<32x64xf32, #tpu.memory_space<vmem>>, %arg8: memref<32x64xf32, #tpu.memory_space<vmem>>, %arg9: memref<32x32xf32, #tpu.memory_space<vmem>>, %arg10: memref<16x32xf32, #tpu.memory_space<vmem>>, %arg11: memref<16x32xf32, #tpu.memory_space<vmem>>, %arg12: memref<16x32xf32, #tpu.memory_space<vmem>>, %arg13: memref<16x32xf32, #tpu.memory_space<vmem>>, %arg14: memref<16x256xf32, #tpu.memory_space<vmem>>, %arg15: memref<64x32xf32, #tpu.memory_space<vmem>>, %arg16: memref<64x32xf32, #tpu.memory_space<vmem>>, %arg17: memref<32x64xf32, #tpu.memory_space<vmem>>, %arg18: memref<32x1xf32, #tpu.memory_space<vmem>>, %arg19: memref<32x1xf32, #tpu.memory_space<vmem>>, %arg20: memref<1x32x256xf32, #tpu.memory_space<vmem>>) attributes {dimension_semantics = [#tpu.dimension_semantics<parallel>], iteration_bounds = array<i64: 2>, scalar_prefetch = 0 : i64, scratch_operands = 0 : i64, tpu.core_type = #tpu.core_type<tc>, window_params = [{transform_indices = @transform_0, window_bounds = array<i64: 1, 16, 16, 32>}, {transform_indices = @transform_1, window_bounds = array<i64: 1, 16, 16, 32>}, {transform_indices = @transform_2, window_bounds = array<i64: 1, 32, 256>}, {pipeline_mode = #tpu.pipeline_mode<synchronous>, transform_indices = @transform_3, window_bounds = array<i64: 16, 32>}, {pipeline_mode = #tpu.pipeline_mode<synchronous>, transform_indices = @transform_4, window_bounds = array<i64: 1, 32>}, {pipeline_mode = #tpu.pipeline_mode<synchronous>, transform_indices = @transform_5, window_bounds = array<i64: 1, 32>}, {pipeline_mode = #tpu.pipeline_mode<synchronous>, transform_indices = @transform_6, window_bounds = array<i64: 32, 64>}, {pipeline_mode = #tpu.pipeline_mode<synchronous>, transform_indices = @transform_7, window_bounds = array<i64: 32, 64>}, {pipeline_mode = #tpu.pipeline_mode<synchronous>, transform_indices = @transform_8, window_bounds = array<i64: 32, 32>}, {pipeline_mode = #tpu.pipeline_mode<synchronous>, transform_indices = @transform_9, window_bounds = array<i64: 16, 32>}, {pipeline_mode = #tpu.pipeline_mode<synchronous>, transform_indices = @transform_10, window_bounds = array<i64: 16, 32>}, {pipeline_mode = #tpu.pipeline_mode<synchronous>, transform_indices = @transform_11, window_bounds = array<i64: 16, 32>}, {pipeline_mode = #tpu.pipeline_mode<synchronous>, transform_indices = @transform_12, window_bounds = array<i64: 16, 32>}, {pipeline_mode = #tpu.pipeline_mode<synchronous>, transform_indices = @transform_13, window_bounds = array<i64: 16, 256>}, {pipeline_mode = #tpu.pipeline_mode<synchronous>, transform_indices = @transform_14, window_bounds = array<i64: 64, 32>}, {pipeline_mode = #tpu.pipeline_mode<synchronous>, transform_indices = @transform_15, window_bounds = array<i64: 64, 32>}, {pipeline_mode = #tpu.pipeline_mode<synchronous>, transform_indices = @transform_16, window_bounds = array<i64: 32, 64>}, {pipeline_mode = #tpu.pipeline_mode<synchronous>, transform_indices = @transform_17, window_bounds = array<i64: 32, 1>}, {pipeline_mode = #tpu.pipeline_mode<synchronous>, transform_indices = @transform_18, window_bounds = array<i64: 32, 1>}, {transform_indices = @transform_19, window_bounds = array<i64: 1, 32, 256>}]} {
    %c0 = arith.constant 0 : index
    %c0_0 = arith.constant 0 : index
    %c0_1 = arith.constant 0 : index
    %c0_2 = arith.constant 0 : index
    %0 = vector.load %arg1[%c0, %c0_0, %c0_1, %c0_2] : memref<1x16x16x32xf32, #tpu.memory_space<vmem>>, vector<1x16x16x32xf32>
    %1 = vector.shape_cast %0 : vector<1x16x16x32xf32> to vector<16x16x32xf32>
    %c0_3 = arith.constant 0 : index
    %c0_4 = arith.constant 0 : index
    %2 = vector.load %arg4[%c0_3, %c0_4] : memref<16x32xf32, #tpu.memory_space<vmem>>, vector<16x32xf32>
    %3 = vector.extract_strided_slice %1 {offsets = [0, 0, 0], sizes = [1, 16, 32], strides = [1, 1, 1]} : vector<16x16x32xf32> to vector<1x16x32xf32>
    %4 = vector.shape_cast %3 : vector<1x16x32xf32> to vector<16x32xf32>
    %5 = vector.extract_strided_slice %2 {offsets = [0, 0], sizes = [1, 32], strides = [1, 1]} : vector<16x32xf32> to vector<1x32xf32>
    %6 = vector.broadcast %5 : vector<1x32xf32> to vector<16x32xf32>
    %7 = arith.mulf %4, %6 : vector<16x32xf32>
    %8 = vector.extract_strided_slice %1 {offsets = [1, 0, 0], sizes = [1, 16, 32], strides = [1, 1, 1]} : vector<16x16x32xf32> to vector<1x16x32xf32>
    %9 = vector.shape_cast %8 : vector<1x16x32xf32> to vector<16x32xf32>
    %10 = vector.extract_strided_slice %2 {offsets = [1, 0], sizes = [1, 32], strides = [1, 1]} : vector<16x32xf32> to vector<1x32xf32>
    %11 = vector.broadcast %10 : vector<1x32xf32> to vector<16x32xf32>
    %12 = arith.mulf %9, %11 : vector<16x32xf32>
    %13 = vector.extract_strided_slice %1 {offsets = [2, 0, 0], sizes = [1, 16, 32], strides = [1, 1, 1]} : vector<16x16x32xf32> to vector<1x16x32xf32>
    %14 = vector.shape_cast %13 : vector<1x16x32xf32> to vector<16x32xf32>
    %15 = vector.extract_strided_slice %2 {offsets = [2, 0], sizes = [1, 32], strides = [1, 1]} : vector<16x32xf32> to vector<1x32xf32>
    %16 = vector.broadcast %15 : vector<1x32xf32> to vector<16x32xf32>
    %17 = arith.mulf %14, %16 : vector<16x32xf32>
    %18 = vector.extract_strided_slice %1 {offsets = [3, 0, 0], sizes = [1, 16, 32], strides = [1, 1, 1]} : vector<16x16x32xf32> to vector<1x16x32xf32>
    %19 = vector.shape_cast %18 : vector<1x16x32xf32> to vector<16x32xf32>
    %20 = vector.extract_strided_slice %2 {offsets = [3, 0], sizes = [1, 32], strides = [1, 1]} : vector<16x32xf32> to vector<1x32xf32>
    %21 = vector.broadcast %20 : vector<1x32xf32> to vector<16x32xf32>
    %22 = arith.mulf %19, %21 : vector<16x32xf32>
    %23 = vector.extract_strided_slice %1 {offsets = [4, 0, 0], sizes = [1, 16, 32], strides = [1, 1, 1]} : vector<16x16x32xf32> to vector<1x16x32xf32>
    %24 = vector.shape_cast %23 : vector<1x16x32xf32> to vector<16x32xf32>
    %25 = vector.extract_strided_slice %2 {offsets = [4, 0], sizes = [1, 32], strides = [1, 1]} : vector<16x32xf32> to vector<1x32xf32>
    %26 = vector.broadcast %25 : vector<1x32xf32> to vector<16x32xf32>
    %27 = arith.mulf %24, %26 : vector<16x32xf32>
    %28 = vector.extract_strided_slice %1 {offsets = [5, 0, 0], sizes = [1, 16, 32], strides = [1, 1, 1]} : vector<16x16x32xf32> to vector<1x16x32xf32>
    %29 = vector.shape_cast %28 : vector<1x16x32xf32> to vector<16x32xf32>
    %30 = vector.extract_strided_slice %2 {offsets = [5, 0], sizes = [1, 32], strides = [1, 1]} : vector<16x32xf32> to vector<1x32xf32>
    %31 = vector.broadcast %30 : vector<1x32xf32> to vector<16x32xf32>
    %32 = arith.mulf %29, %31 : vector<16x32xf32>
    %33 = vector.extract_strided_slice %1 {offsets = [6, 0, 0], sizes = [1, 16, 32], strides = [1, 1, 1]} : vector<16x16x32xf32> to vector<1x16x32xf32>
    %34 = vector.shape_cast %33 : vector<1x16x32xf32> to vector<16x32xf32>
    %35 = vector.extract_strided_slice %2 {offsets = [6, 0], sizes = [1, 32], strides = [1, 1]} : vector<16x32xf32> to vector<1x32xf32>
    %36 = vector.broadcast %35 : vector<1x32xf32> to vector<16x32xf32>
    %37 = arith.mulf %34, %36 : vector<16x32xf32>
    %38 = vector.extract_strided_slice %1 {offsets = [7, 0, 0], sizes = [1, 16, 32], strides = [1, 1, 1]} : vector<16x16x32xf32> to vector<1x16x32xf32>
    %39 = vector.shape_cast %38 : vector<1x16x32xf32> to vector<16x32xf32>
    %40 = vector.extract_strided_slice %2 {offsets = [7, 0], sizes = [1, 32], strides = [1, 1]} : vector<16x32xf32> to vector<1x32xf32>
    %41 = vector.broadcast %40 : vector<1x32xf32> to vector<16x32xf32>
    %42 = arith.mulf %39, %41 : vector<16x32xf32>
    %43 = vector.extract_strided_slice %1 {offsets = [8, 0, 0], sizes = [1, 16, 32], strides = [1, 1, 1]} : vector<16x16x32xf32> to vector<1x16x32xf32>
    %44 = vector.shape_cast %43 : vector<1x16x32xf32> to vector<16x32xf32>
    %45 = vector.extract_strided_slice %2 {offsets = [8, 0], sizes = [1, 32], strides = [1, 1]} : vector<16x32xf32> to vector<1x32xf32>
    %46 = vector.broadcast %45 : vector<1x32xf32> to vector<16x32xf32>
    %47 = arith.mulf %44, %46 : vector<16x32xf32>
    %48 = vector.extract_strided_slice %1 {offsets = [9, 0, 0], sizes = [1, 16, 32], strides = [1, 1, 1]} : vector<16x16x32xf32> to vector<1x16x32xf32>
    %49 = vector.shape_cast %48 : vector<1x16x32xf32> to vector<16x32xf32>
    %50 = vector.extract_strided_slice %2 {offsets = [9, 0], sizes = [1, 32], strides = [1, 1]} : vector<16x32xf32> to vector<1x32xf32>
    %51 = vector.broadcast %50 : vector<1x32xf32> to vector<16x32xf32>
    %52 = arith.mulf %49, %51 : vector<16x32xf32>
    %53 = vector.extract_strided_slice %1 {offsets = [10, 0, 0], sizes = [1, 16, 32], strides = [1, 1, 1]} : vector<16x16x32xf32> to vector<1x16x32xf32>
    %54 = vector.shape_cast %53 : vector<1x16x32xf32> to vector<16x32xf32>
    %55 = vector.extract_strided_slice %2 {offsets = [10, 0], sizes = [1, 32], strides = [1, 1]} : vector<16x32xf32> to vector<1x32xf32>
    %56 = vector.broadcast %55 : vector<1x32xf32> to vector<16x32xf32>
    %57 = arith.mulf %54, %56 : vector<16x32xf32>
    %58 = vector.extract_strided_slice %1 {offsets = [11, 0, 0], sizes = [1, 16, 32], strides = [1, 1, 1]} : vector<16x16x32xf32> to vector<1x16x32xf32>
    %59 = vector.shape_cast %58 : vector<1x16x32xf32> to vector<16x32xf32>
    %60 = vector.extract_strided_slice %2 {offsets = [11, 0], sizes = [1, 32], strides = [1, 1]} : vector<16x32xf32> to vector<1x32xf32>
    %61 = vector.broadcast %60 : vector<1x32xf32> to vector<16x32xf32>
    %62 = arith.mulf %59, %61 : vector<16x32xf32>
    %63 = vector.extract_strided_slice %1 {offsets = [12, 0, 0], sizes = [1, 16, 32], strides = [1, 1, 1]} : vector<16x16x32xf32> to vector<1x16x32xf32>
    %64 = vector.shape_cast %63 : vector<1x16x32xf32> to vector<16x32xf32>
    %65 = vector.extract_strided_slice %2 {offsets = [12, 0], sizes = [1, 32], strides = [1, 1]} : vector<16x32xf32> to vector<1x32xf32>
    %66 = vector.broadcast %65 : vector<1x32xf32> to vector<16x32xf32>
    %67 = arith.mulf %64, %66 : vector<16x32xf32>
    %68 = vector.extract_strided_slice %1 {offsets = [13, 0, 0], sizes = [1, 16, 32], strides = [1, 1, 1]} : vector<16x16x32xf32> to vector<1x16x32xf32>
    %69 = vector.shape_cast %68 : vector<1x16x32xf32> to vector<16x32xf32>
    %70 = vector.extract_strided_slice %2 {offsets = [13, 0], sizes = [1, 32], strides = [1, 1]} : vector<16x32xf32> to vector<1x32xf32>
    %71 = vector.broadcast %70 : vector<1x32xf32> to vector<16x32xf32>
    %72 = arith.mulf %69, %71 : vector<16x32xf32>
    %73 = vector.extract_strided_slice %1 {offsets = [14, 0, 0], sizes = [1, 16, 32], strides = [1, 1, 1]} : vector<16x16x32xf32> to vector<1x16x32xf32>
    %74 = vector.shape_cast %73 : vector<1x16x32xf32> to vector<16x32xf32>
    %75 = vector.extract_strided_slice %2 {offsets = [14, 0], sizes = [1, 32], strides = [1, 1]} : vector<16x32xf32> to vector<1x32xf32>
    %76 = vector.broadcast %75 : vector<1x32xf32> to vector<16x32xf32>
    %77 = arith.mulf %74, %76 : vector<16x32xf32>
    %78 = vector.extract_strided_slice %1 {offsets = [15, 0, 0], sizes = [1, 16, 32], strides = [1, 1, 1]} : vector<16x16x32xf32> to vector<1x16x32xf32>
    %79 = vector.shape_cast %78 : vector<1x16x32xf32> to vector<16x32xf32>
    %80 = vector.extract_strided_slice %2 {offsets = [15, 0], sizes = [1, 32], strides = [1, 1]} : vector<16x32xf32> to vector<1x32xf32>
    %81 = vector.broadcast %80 : vector<1x32xf32> to vector<16x32xf32>
    %82 = arith.mulf %79, %81 : vector<16x32xf32>
    %83 = arith.addf %7, %12 : vector<16x32xf32>
    %84 = arith.addf %17, %22 : vector<16x32xf32>
    %85 = arith.addf %27, %32 : vector<16x32xf32>
    %86 = arith.addf %37, %42 : vector<16x32xf32>
    %87 = arith.addf %47, %52 : vector<16x32xf32>
    %88 = arith.addf %57, %62 : vector<16x32xf32>
    %89 = arith.addf %67, %72 : vector<16x32xf32>
    %90 = arith.addf %77, %82 : vector<16x32xf32>
    %91 = arith.addf %83, %84 : vector<16x32xf32>
    %92 = arith.addf %85, %86 : vector<16x32xf32>
    %93 = arith.addf %87, %88 : vector<16x32xf32>
    %94 = arith.addf %89, %90 : vector<16x32xf32>
    %95 = arith.addf %91, %92 : vector<16x32xf32>
    %96 = arith.addf %93, %94 : vector<16x32xf32>
    %97 = arith.addf %95, %96 : vector<16x32xf32>
    %c0_5 = arith.constant 0 : index
    %c0_6 = arith.constant 0 : index
    %98 = vector.load %arg5[%c0_5, %c0_6] : memref<1x32xf32, #tpu.memory_space<vmem>>, vector<1x32xf32>
    %c0_7 = arith.constant 0 : index
    %c0_8 = arith.constant 0 : index
    %99 = vector.load %arg6[%c0_7, %c0_8] : memref<1x32xf32, #tpu.memory_space<vmem>>, vector<1x32xf32>
    %cst = arith.constant dense<0.000000e+00> : vector<16xf32>
    %100 = vector.multi_reduction <add>, %97, %cst [1] : vector<16x32xf32> to vector<16xf32>
    %101 = vector.shape_cast %100 : vector<16xf32> to vector<16x1xf32>
    %cst_9 = arith.constant 3.200000e+01 : f32
    %102 = vector.broadcast %cst_9 : f32 to vector<16x1xf32>
    %103 = arith.divf %101, %102 : vector<16x1xf32>
    %104 = vector.broadcast %103 : vector<16x1xf32> to vector<16x32xf32>
    %105 = arith.subf %97, %104 : vector<16x32xf32>
    %106 = arith.mulf %105, %105 : vector<16x32xf32>
    %cst_10 = arith.constant dense<0.000000e+00> : vector<16xf32>
    %107 = vector.multi_reduction <add>, %106, %cst_10 [1] : vector<16x32xf32> to vector<16xf32>
    %108 = vector.shape_cast %107 : vector<16xf32> to vector<16x1xf32>
    %cst_11 = arith.constant 3.200000e+01 : f32
    %109 = vector.broadcast %cst_11 : f32 to vector<16x1xf32>
    %110 = arith.divf %108, %109 : vector<16x1xf32>
    %111 = vector.broadcast %103 : vector<16x1xf32> to vector<16x32xf32>
    %112 = arith.subf %97, %111 : vector<16x32xf32>
    %cst_12 = arith.constant 9.99999974E-6 : f32
    %113 = vector.broadcast %cst_12 : f32 to vector<16x1xf32>
    %114 = arith.addf %110, %113 : vector<16x1xf32>
    %115 = math.rsqrt %114 : vector<16x1xf32>
    %116 = vector.broadcast %115 : vector<16x1xf32> to vector<16x32xf32>
    %117 = arith.mulf %112, %116 : vector<16x32xf32>
    %118 = vector.broadcast %98 : vector<1x32xf32> to vector<16x32xf32>
    %119 = arith.mulf %117, %118 : vector<16x32xf32>
    %120 = vector.broadcast %99 : vector<1x32xf32> to vector<16x32xf32>
    %121 = arith.addf %119, %120 : vector<16x32xf32>
    %c0_13 = arith.constant 0 : index
    %c0_14 = arith.constant 0 : index
    %c0_15 = arith.constant 0 : index
    %c0_16 = arith.constant 0 : index
    %122 = vector.load %arg2[%c0_13, %c0_14, %c0_15, %c0_16] : memref<1x16x16x32xf32, #tpu.memory_space<vmem>>, vector<1x16x16x32xf32>
    %123 = vector.shape_cast %122 : vector<1x16x16x32xf32> to vector<16x16x32xf32>
    %124 = vector.extract_strided_slice %123 {offsets = [0, 0, 0], sizes = [1, 16, 32], strides = [1, 1, 1]} : vector<16x16x32xf32> to vector<1x16x32xf32>
    %125 = vector.shape_cast %124 : vector<1x16x32xf32> to vector<16x32xf32>
    %126 = vector.extract_strided_slice %123 {offsets = [1, 0, 0], sizes = [1, 16, 32], strides = [1, 1, 1]} : vector<16x16x32xf32> to vector<1x16x32xf32>
    %127 = vector.shape_cast %126 : vector<1x16x32xf32> to vector<16x32xf32>
    %128 = vector.extract_strided_slice %123 {offsets = [2, 0, 0], sizes = [1, 16, 32], strides = [1, 1, 1]} : vector<16x16x32xf32> to vector<1x16x32xf32>
    %129 = vector.shape_cast %128 : vector<1x16x32xf32> to vector<16x32xf32>
    %130 = vector.extract_strided_slice %123 {offsets = [3, 0, 0], sizes = [1, 16, 32], strides = [1, 1, 1]} : vector<16x16x32xf32> to vector<1x16x32xf32>
    %131 = vector.shape_cast %130 : vector<1x16x32xf32> to vector<16x32xf32>
    %132 = vector.extract_strided_slice %123 {offsets = [4, 0, 0], sizes = [1, 16, 32], strides = [1, 1, 1]} : vector<16x16x32xf32> to vector<1x16x32xf32>
    %133 = vector.shape_cast %132 : vector<1x16x32xf32> to vector<16x32xf32>
    %134 = vector.extract_strided_slice %123 {offsets = [5, 0, 0], sizes = [1, 16, 32], strides = [1, 1, 1]} : vector<16x16x32xf32> to vector<1x16x32xf32>
    %135 = vector.shape_cast %134 : vector<1x16x32xf32> to vector<16x32xf32>
    %136 = vector.extract_strided_slice %123 {offsets = [6, 0, 0], sizes = [1, 16, 32], strides = [1, 1, 1]} : vector<16x16x32xf32> to vector<1x16x32xf32>
    %137 = vector.shape_cast %136 : vector<1x16x32xf32> to vector<16x32xf32>
    %138 = vector.extract_strided_slice %123 {offsets = [7, 0, 0], sizes = [1, 16, 32], strides = [1, 1, 1]} : vector<16x16x32xf32> to vector<1x16x32xf32>
    %139 = vector.shape_cast %138 : vector<1x16x32xf32> to vector<16x32xf32>
    %140 = vector.extract_strided_slice %123 {offsets = [8, 0, 0], sizes = [1, 16, 32], strides = [1, 1, 1]} : vector<16x16x32xf32> to vector<1x16x32xf32>
    %141 = vector.shape_cast %140 : vector<1x16x32xf32> to vector<16x32xf32>
    %142 = vector.extract_strided_slice %123 {offsets = [9, 0, 0], sizes = [1, 16, 32], strides = [1, 1, 1]} : vector<16x16x32xf32> to vector<1x16x32xf32>
    %143 = vector.shape_cast %142 : vector<1x16x32xf32> to vector<16x32xf32>
    %144 = vector.extract_strided_slice %123 {offsets = [10, 0, 0], sizes = [1, 16, 32], strides = [1, 1, 1]} : vector<16x16x32xf32> to vector<1x16x32xf32>
    %145 = vector.shape_cast %144 : vector<1x16x32xf32> to vector<16x32xf32>
    %146 = vector.extract_strided_slice %123 {offsets = [11, 0, 0], sizes = [1, 16, 32], strides = [1, 1, 1]} : vector<16x16x32xf32> to vector<1x16x32xf32>
    %147 = vector.shape_cast %146 : vector<1x16x32xf32> to vector<16x32xf32>
    %148 = vector.extract_strided_slice %123 {offsets = [12, 0, 0], sizes = [1, 16, 32], strides = [1, 1, 1]} : vector<16x16x32xf32> to vector<1x16x32xf32>
    %149 = vector.shape_cast %148 : vector<1x16x32xf32> to vector<16x32xf32>
    %150 = vector.extract_strided_slice %123 {offsets = [13, 0, 0], sizes = [1, 16, 32], strides = [1, 1, 1]} : vector<16x16x32xf32> to vector<1x16x32xf32>
    %151 = vector.shape_cast %150 : vector<1x16x32xf32> to vector<16x32xf32>
    %152 = vector.extract_strided_slice %123 {offsets = [14, 0, 0], sizes = [1, 16, 32], strides = [1, 1, 1]} : vector<16x16x32xf32> to vector<1x16x32xf32>
    %153 = vector.shape_cast %152 : vector<1x16x32xf32> to vector<16x32xf32>
    %154 = vector.extract_strided_slice %123 {offsets = [15, 0, 0], sizes = [1, 16, 32], strides = [1, 1, 1]} : vector<16x16x32xf32> to vector<1x16x32xf32>
    %155 = vector.shape_cast %154 : vector<1x16x32xf32> to vector<16x32xf32>
    %156 = arith.maximumf %125, %127 : vector<16x32xf32>
    %157 = arith.maximumf %129, %131 : vector<16x32xf32>
    %158 = arith.maximumf %133, %135 : vector<16x32xf32>
    %159 = arith.maximumf %137, %139 : vector<16x32xf32>
    %160 = arith.maximumf %141, %143 : vector<16x32xf32>
    %161 = arith.maximumf %145, %147 : vector<16x32xf32>
    %162 = arith.maximumf %149, %151 : vector<16x32xf32>
    %163 = arith.maximumf %153, %155 : vector<16x32xf32>
    %164 = arith.maximumf %156, %157 : vector<16x32xf32>
    %165 = arith.maximumf %158, %159 : vector<16x32xf32>
    %166 = arith.maximumf %160, %161 : vector<16x32xf32>
    %167 = arith.maximumf %162, %163 : vector<16x32xf32>
    %168 = arith.maximumf %164, %165 : vector<16x32xf32>
    %169 = arith.maximumf %166, %167 : vector<16x32xf32>
    %170 = arith.maximumf %168, %169 : vector<16x32xf32>
    %cst_17 = arith.constant dense<0.000000e+00> : vector<16xf32>
    %171 = vector.multi_reduction <add>, %170, %cst_17 [1] : vector<16x32xf32> to vector<16xf32>
    %172 = vector.shape_cast %171 : vector<16xf32> to vector<16x1xf32>
    %cst_18 = arith.constant 3.200000e+01 : f32
    %173 = vector.broadcast %cst_18 : f32 to vector<16x1xf32>
    %174 = arith.divf %172, %173 : vector<16x1xf32>
    %175 = vector.broadcast %174 : vector<16x1xf32> to vector<16x32xf32>
    %176 = arith.subf %170, %175 : vector<16x32xf32>
    %177 = arith.mulf %176, %176 : vector<16x32xf32>
    %cst_19 = arith.constant dense<0.000000e+00> : vector<16xf32>
    %178 = vector.multi_reduction <add>, %177, %cst_19 [1] : vector<16x32xf32> to vector<16xf32>
    %179 = vector.shape_cast %178 : vector<16xf32> to vector<16x1xf32>
    %cst_20 = arith.constant 3.200000e+01 : f32
    %180 = vector.broadcast %cst_20 : f32 to vector<16x1xf32>
    %181 = arith.divf %179, %180 : vector<16x1xf32>
    %182 = vector.broadcast %174 : vector<16x1xf32> to vector<16x32xf32>
    %183 = arith.subf %170, %182 : vector<16x32xf32>
    %cst_21 = arith.constant 9.99999974E-6 : f32
    %184 = vector.broadcast %cst_21 : f32 to vector<16x1xf32>
    %185 = arith.addf %181, %184 : vector<16x1xf32>
    %186 = math.rsqrt %185 : vector<16x1xf32>
    %187 = vector.broadcast %186 : vector<16x1xf32> to vector<16x32xf32>
    %188 = arith.mulf %183, %187 : vector<16x32xf32>
    %189 = vector.broadcast %98 : vector<1x32xf32> to vector<16x32xf32>
    %190 = arith.mulf %188, %189 : vector<16x32xf32>
    %191 = vector.broadcast %99 : vector<1x32xf32> to vector<16x32xf32>
    %192 = arith.addf %190, %191 : vector<16x32xf32>
    %c0_22 = arith.constant 0 : index
    %c0_23 = arith.constant 0 : index
    %193 = vector.load %arg7[%c0_22, %c0_23] : memref<32x64xf32, #tpu.memory_space<vmem>>, vector<32x64xf32>
    %cst_24 = arith.constant dense<0.000000e+00> : vector<16x64xf32>
    %194 = tpu.matmul %121, %193, %cst_24 {dimension_numbers = #tpu.dot_dimension_numbers<[1], [0], [0], [1], [0, 0, 1, 1], [], []>} : vector<16x32xf32>, vector<32x64xf32>, vector<16x64xf32> -> vector<16x64xf32>
    %c0_25 = arith.constant 0 : index
    %c0_26 = arith.constant 0 : index
    %195 = vector.load %arg8[%c0_25, %c0_26] : memref<32x64xf32, #tpu.memory_space<vmem>>, vector<32x64xf32>
    %cst_27 = arith.constant dense<0.000000e+00> : vector<16x64xf32>
    %196 = tpu.matmul %192, %195, %cst_27 {dimension_numbers = #tpu.dot_dimension_numbers<[1], [0], [0], [1], [0, 0, 1, 1], [], []>} : vector<16x32xf32>, vector<32x64xf32>, vector<16x64xf32> -> vector<16x64xf32>
    %c0_28 = arith.constant 0 : index
    %c0_29 = arith.constant 0 : index
    %197 = vector.load %arg9[%c0_28, %c0_29] : memref<32x32xf32, #tpu.memory_space<vmem>>, vector<32x32xf32>
    %cst_30 = arith.constant dense<0.000000e+00> : vector<16x32xf32>
    %198 = tpu.matmul %192, %197, %cst_30 {dimension_numbers = #tpu.dot_dimension_numbers<[1], [0], [0], [1], [0, 0, 1, 1], [], []>} : vector<16x32xf32>, vector<32x32xf32>, vector<16x32xf32> -> vector<16x32xf32>
    %199 = vector.extract_strided_slice %194 {offsets = [0, 0], sizes = [16, 32], strides = [1, 1]} : vector<16x64xf32> to vector<16x32xf32>
    %c0_31 = arith.constant 0 : index
    %c0_32 = arith.constant 0 : index
    %200 = vector.load %arg10[%c0_31, %c0_32] : memref<16x32xf32, #tpu.memory_space<vmem>>, vector<16x32xf32>
    %201 = arith.mulf %199, %200 : vector<16x32xf32>
    %202 = vector.extract_strided_slice %194 {offsets = [0, 32], sizes = [16, 32], strides = [1, 1]} : vector<16x64xf32> to vector<16x32xf32>
    %c0_33 = arith.constant 0 : index
    %c0_34 = arith.constant 0 : index
    %203 = vector.load %arg11[%c0_33, %c0_34] : memref<16x32xf32, #tpu.memory_space<vmem>>, vector<16x32xf32>
    %204 = arith.mulf %202, %203 : vector<16x32xf32>
    %205 = arith.addf %201, %204 : vector<16x32xf32>
    %206 = vector.extract_strided_slice %196 {offsets = [0, 0], sizes = [16, 32], strides = [1, 1]} : vector<16x64xf32> to vector<16x32xf32>
    %c0_35 = arith.constant 0 : index
    %c0_36 = arith.constant 0 : index
    %207 = vector.load %arg12[%c0_35, %c0_36] : memref<16x32xf32, #tpu.memory_space<vmem>>, vector<16x32xf32>
    %208 = arith.mulf %206, %207 : vector<16x32xf32>
    %209 = vector.extract_strided_slice %196 {offsets = [0, 32], sizes = [16, 32], strides = [1, 1]} : vector<16x64xf32> to vector<16x32xf32>
    %c0_37 = arith.constant 0 : index
    %c0_38 = arith.constant 0 : index
    %210 = vector.load %arg13[%c0_37, %c0_38] : memref<16x32xf32, #tpu.memory_space<vmem>>, vector<16x32xf32>
    %211 = arith.mulf %209, %210 : vector<16x32xf32>
    %212 = arith.addf %208, %211 : vector<16x32xf32>
    %213 = vector.extract_strided_slice %205 {offsets = [0, 0], sizes = [16, 8], strides = [1, 1]} : vector<16x32xf32> to vector<16x8xf32>
    %214 = vector.extract_strided_slice %212 {offsets = [0, 0], sizes = [16, 8], strides = [1, 1]} : vector<16x32xf32> to vector<16x8xf32>
    %cst_39 = arith.constant dense<0.000000e+00> : vector<16x16xf32>
    %215 = tpu.matmul %213, %214, %cst_39 {dimension_numbers = #tpu.dot_dimension_numbers<[1], [1], [0], [0], [0, 0, 1, 0], [], []>} : vector<16x8xf32>, vector<16x8xf32>, vector<16x16xf32> -> vector<16x16xf32>
    %cst_40 = arith.constant 0.353553385 : f32
    %216 = vector.broadcast %cst_40 : f32 to vector<16x16xf32>
    %217 = arith.mulf %215, %216 : vector<16x16xf32>
    %cst_41 = arith.constant dense<0xFF800000> : vector<16xf32>
    %218 = vector.multi_reduction <maximumf>, %217, %cst_41 [1] : vector<16x16xf32> to vector<16xf32>
    %219 = vector.shape_cast %218 : vector<16xf32> to vector<16x1xf32>
    %220 = vector.broadcast %219 : vector<16x1xf32> to vector<16x16xf32>
    %221 = arith.subf %217, %220 : vector<16x16xf32>
    %222 = math.exp %221 : vector<16x16xf32>
    %cst_42 = arith.constant dense<0.000000e+00> : vector<16xf32>
    %223 = vector.multi_reduction <add>, %222, %cst_42 [1] : vector<16x16xf32> to vector<16xf32>
    %224 = vector.shape_cast %223 : vector<16xf32> to vector<16x1xf32>
    %225 = vector.broadcast %224 : vector<16x1xf32> to vector<16x16xf32>
    %226 = arith.divf %222, %225 : vector<16x16xf32>
    %227 = vector.extract_strided_slice %198 {offsets = [0, 0], sizes = [16, 8], strides = [1, 1]} : vector<16x32xf32> to vector<16x8xf32>
    %cst_43 = arith.constant dense<0.000000e+00> : vector<16x8xf32>
    %228 = tpu.matmul %226, %227, %cst_43 {dimension_numbers = #tpu.dot_dimension_numbers<[1], [0], [0], [1], [0, 0, 1, 1], [], []>} : vector<16x16xf32>, vector<16x8xf32>, vector<16x8xf32> -> vector<16x8xf32>
    %229 = vector.extract_strided_slice %205 {offsets = [0, 8], sizes = [16, 8], strides = [1, 1]} : vector<16x32xf32> to vector<16x8xf32>
    %230 = vector.extract_strided_slice %212 {offsets = [0, 8], sizes = [16, 8], strides = [1, 1]} : vector<16x32xf32> to vector<16x8xf32>
    %cst_44 = arith.constant dense<0.000000e+00> : vector<16x16xf32>
    %231 = tpu.matmul %229, %230, %cst_44 {dimension_numbers = #tpu.dot_dimension_numbers<[1], [1], [0], [0], [0, 0, 1, 0], [], []>} : vector<16x8xf32>, vector<16x8xf32>, vector<16x16xf32> -> vector<16x16xf32>
    %cst_45 = arith.constant 0.353553385 : f32
    %232 = vector.broadcast %cst_45 : f32 to vector<16x16xf32>
    %233 = arith.mulf %231, %232 : vector<16x16xf32>
    %cst_46 = arith.constant dense<0xFF800000> : vector<16xf32>
    %234 = vector.multi_reduction <maximumf>, %233, %cst_46 [1] : vector<16x16xf32> to vector<16xf32>
    %235 = vector.shape_cast %234 : vector<16xf32> to vector<16x1xf32>
    %236 = vector.broadcast %235 : vector<16x1xf32> to vector<16x16xf32>
    %237 = arith.subf %233, %236 : vector<16x16xf32>
    %238 = math.exp %237 : vector<16x16xf32>
    %cst_47 = arith.constant dense<0.000000e+00> : vector<16xf32>
    %239 = vector.multi_reduction <add>, %238, %cst_47 [1] : vector<16x16xf32> to vector<16xf32>
    %240 = vector.shape_cast %239 : vector<16xf32> to vector<16x1xf32>
    %241 = vector.broadcast %240 : vector<16x1xf32> to vector<16x16xf32>
    %242 = arith.divf %238, %241 : vector<16x16xf32>
    %243 = vector.extract_strided_slice %198 {offsets = [0, 8], sizes = [16, 8], strides = [1, 1]} : vector<16x32xf32> to vector<16x8xf32>
    %cst_48 = arith.constant dense<0.000000e+00> : vector<16x8xf32>
    %244 = tpu.matmul %242, %243, %cst_48 {dimension_numbers = #tpu.dot_dimension_numbers<[1], [0], [0], [1], [0, 0, 1, 1], [], []>} : vector<16x16xf32>, vector<16x8xf32>, vector<16x8xf32> -> vector<16x8xf32>
    %245 = vector.extract_strided_slice %205 {offsets = [0, 16], sizes = [16, 8], strides = [1, 1]} : vector<16x32xf32> to vector<16x8xf32>
    %246 = vector.extract_strided_slice %212 {offsets = [0, 16], sizes = [16, 8], strides = [1, 1]} : vector<16x32xf32> to vector<16x8xf32>
    %cst_49 = arith.constant dense<0.000000e+00> : vector<16x16xf32>
    %247 = tpu.matmul %245, %246, %cst_49 {dimension_numbers = #tpu.dot_dimension_numbers<[1], [1], [0], [0], [0, 0, 1, 0], [], []>} : vector<16x8xf32>, vector<16x8xf32>, vector<16x16xf32> -> vector<16x16xf32>
    %cst_50 = arith.constant 0.353553385 : f32
    %248 = vector.broadcast %cst_50 : f32 to vector<16x16xf32>
    %249 = arith.mulf %247, %248 : vector<16x16xf32>
    %cst_51 = arith.constant dense<0xFF800000> : vector<16xf32>
    %250 = vector.multi_reduction <maximumf>, %249, %cst_51 [1] : vector<16x16xf32> to vector<16xf32>
    %251 = vector.shape_cast %250 : vector<16xf32> to vector<16x1xf32>
    %252 = vector.broadcast %251 : vector<16x1xf32> to vector<16x16xf32>
    %253 = arith.subf %249, %252 : vector<16x16xf32>
    %254 = math.exp %253 : vector<16x16xf32>
    %cst_52 = arith.constant dense<0.000000e+00> : vector<16xf32>
    %255 = vector.multi_reduction <add>, %254, %cst_52 [1] : vector<16x16xf32> to vector<16xf32>
    %256 = vector.shape_cast %255 : vector<16xf32> to vector<16x1xf32>
    %257 = vector.broadcast %256 : vector<16x1xf32> to vector<16x16xf32>
    %258 = arith.divf %254, %257 : vector<16x16xf32>
    %259 = vector.extract_strided_slice %198 {offsets = [0, 16], sizes = [16, 8], strides = [1, 1]} : vector<16x32xf32> to vector<16x8xf32>
    %cst_53 = arith.constant dense<0.000000e+00> : vector<16x8xf32>
    %260 = tpu.matmul %258, %259, %cst_53 {dimension_numbers = #tpu.dot_dimension_numbers<[1], [0], [0], [1], [0, 0, 1, 1], [], []>} : vector<16x16xf32>, vector<16x8xf32>, vector<16x8xf32> -> vector<16x8xf32>
    %261 = vector.extract_strided_slice %205 {offsets = [0, 24], sizes = [16, 8], strides = [1, 1]} : vector<16x32xf32> to vector<16x8xf32>
    %262 = vector.extract_strided_slice %212 {offsets = [0, 24], sizes = [16, 8], strides = [1, 1]} : vector<16x32xf32> to vector<16x8xf32>
    %cst_54 = arith.constant dense<0.000000e+00> : vector<16x16xf32>
    %263 = tpu.matmul %261, %262, %cst_54 {dimension_numbers = #tpu.dot_dimension_numbers<[1], [1], [0], [0], [0, 0, 1, 0], [], []>} : vector<16x8xf32>, vector<16x8xf32>, vector<16x16xf32> -> vector<16x16xf32>
    %cst_55 = arith.constant 0.353553385 : f32
    %264 = vector.broadcast %cst_55 : f32 to vector<16x16xf32>
    %265 = arith.mulf %263, %264 : vector<16x16xf32>
    %cst_56 = arith.constant dense<0xFF800000> : vector<16xf32>
    %266 = vector.multi_reduction <maximumf>, %265, %cst_56 [1] : vector<16x16xf32> to vector<16xf32>
    %267 = vector.shape_cast %266 : vector<16xf32> to vector<16x1xf32>
    %268 = vector.broadcast %267 : vector<16x1xf32> to vector<16x16xf32>
    %269 = arith.subf %265, %268 : vector<16x16xf32>
    %270 = math.exp %269 : vector<16x16xf32>
    %cst_57 = arith.constant dense<0.000000e+00> : vector<16xf32>
    %271 = vector.multi_reduction <add>, %270, %cst_57 [1] : vector<16x16xf32> to vector<16xf32>
    %272 = vector.shape_cast %271 : vector<16xf32> to vector<16x1xf32>
    %273 = vector.broadcast %272 : vector<16x1xf32> to vector<16x16xf32>
    %274 = arith.divf %270, %273 : vector<16x16xf32>
    %275 = vector.extract_strided_slice %198 {offsets = [0, 24], sizes = [16, 8], strides = [1, 1]} : vector<16x32xf32> to vector<16x8xf32>
    %cst_58 = arith.constant dense<0.000000e+00> : vector<16x8xf32>
    %276 = tpu.matmul %274, %275, %cst_58 {dimension_numbers = #tpu.dot_dimension_numbers<[1], [0], [0], [1], [0, 0, 1, 1], [], []>} : vector<16x16xf32>, vector<16x8xf32>, vector<16x8xf32> -> vector<16x8xf32>
    %277 = tpu.concatenate %228, %244, %260, %276 in 1 : vector<16x8xf32>, vector<16x8xf32>, vector<16x8xf32>, vector<16x8xf32> -> vector<16x32xf32>
    %c0_59 = arith.constant 0 : index
    %c0_60 = arith.constant 0 : index
    %c0_61 = arith.constant 0 : index
    %278 = vector.load %arg3[%c0_59, %c0_60, %c0_61] : memref<1x32x256xf32, #tpu.memory_space<vmem>>, vector<1x32x256xf32>
    %279 = vector.shape_cast %278 : vector<1x32x256xf32> to vector<32x256xf32>
    %c0_62 = arith.constant 0 : index
    %c0_63 = arith.constant 0 : index
    %280 = vector.load %arg16[%c0_62, %c0_63] : memref<64x32xf32, #tpu.memory_space<vmem>>, vector<64x32xf32>
    %cst_64 = arith.constant dense<0.000000e+00> : vector<64x16xf32>
    %281 = tpu.matmul %280, %277, %cst_64 {dimension_numbers = #tpu.dot_dimension_numbers<[1], [1], [0], [0], [0, 0, 1, 0], [], []>} : vector<64x32xf32>, vector<16x32xf32>, vector<64x16xf32> -> vector<64x16xf32>
    %c0_65 = arith.constant 0 : index
    %c0_66 = arith.constant 0 : index
    %282 = vector.load %arg15[%c0_65, %c0_66] : memref<64x32xf32, #tpu.memory_space<vmem>>, vector<64x32xf32>
    %cst_67 = arith.constant dense<0.000000e+00> : vector<64x256xf32>
    %283 = tpu.matmul %282, %279, %cst_67 {dimension_numbers = #tpu.dot_dimension_numbers<[1], [0], [0], [1], [0, 0, 1, 1], [], []>} : vector<64x32xf32>, vector<32x256xf32>, vector<64x256xf32> -> vector<64x256xf32>
    %c0_68 = arith.constant 0 : index
    %c0_69 = arith.constant 0 : index
    %284 = vector.load %arg14[%c0_68, %c0_69] : memref<16x256xf32, #tpu.memory_space<vmem>>, vector<16x256xf32>
    %cst_70 = arith.constant dense<0.000000e+00> : vector<64x256xf32>
    %285 = tpu.matmul %281, %284, %cst_70 {dimension_numbers = #tpu.dot_dimension_numbers<[1], [0], [0], [1], [0, 0, 1, 1], [], []>} : vector<64x16xf32>, vector<16x256xf32>, vector<64x256xf32> -> vector<64x256xf32>
    %286 = arith.addf %283, %285 : vector<64x256xf32>
    %cst_71 = arith.constant 0.000000e+00 : f32
    %287 = vector.broadcast %cst_71 : f32 to vector<64x256xf32>
    %288 = arith.cmpf oge, %286, %287 : vector<64x256xf32>
    %cst_72 = arith.constant 0.00999999977 : f32
    %289 = vector.broadcast %cst_72 : f32 to vector<64x256xf32>
    %290 = arith.mulf %289, %286 : vector<64x256xf32>
    %291 = arith.select %288, %286, %290 : vector<64x256xi1>, vector<64x256xf32>
    %c0_73 = arith.constant 0 : index
    %c0_74 = arith.constant 0 : index
    %292 = vector.load %arg17[%c0_73, %c0_74] : memref<32x64xf32, #tpu.memory_space<vmem>>, vector<32x64xf32>
    %cst_75 = arith.constant dense<0.000000e+00> : vector<32x256xf32>
    %293 = tpu.matmul %292, %291, %cst_75 {dimension_numbers = #tpu.dot_dimension_numbers<[1], [0], [0], [1], [0, 0, 1, 1], [], []>} : vector<32x64xf32>, vector<64x256xf32>, vector<32x256xf32> -> vector<32x256xf32>
    %cst_76 = arith.constant dense<0.000000e+00> : vector<256xf32>
    %294 = vector.multi_reduction <add>, %293, %cst_76 [0] : vector<32x256xf32> to vector<256xf32>
    %295 = vector.shape_cast %294 : vector<256xf32> to vector<1x256xf32>
    %cst_77 = arith.constant 3.200000e+01 : f32
    %296 = vector.broadcast %cst_77 : f32 to vector<1x256xf32>
    %297 = arith.divf %295, %296 : vector<1x256xf32>
    %298 = vector.broadcast %297 : vector<1x256xf32> to vector<32x256xf32>
    %299 = arith.subf %293, %298 : vector<32x256xf32>
    %300 = arith.mulf %299, %299 : vector<32x256xf32>
    %cst_78 = arith.constant dense<0.000000e+00> : vector<256xf32>
    %301 = vector.multi_reduction <add>, %300, %cst_78 [0] : vector<32x256xf32> to vector<256xf32>
    %302 = vector.shape_cast %301 : vector<256xf32> to vector<1x256xf32>
    %cst_79 = arith.constant 3.200000e+01 : f32
    %303 = vector.broadcast %cst_79 : f32 to vector<1x256xf32>
    %304 = arith.divf %302, %303 : vector<1x256xf32>
    %305 = vector.broadcast %297 : vector<1x256xf32> to vector<32x256xf32>
    %306 = arith.subf %293, %305 : vector<32x256xf32>
    %cst_80 = arith.constant 9.99999974E-6 : f32
    %307 = vector.broadcast %cst_80 : f32 to vector<1x256xf32>
    %308 = arith.addf %304, %307 : vector<1x256xf32>
    %309 = math.rsqrt %308 : vector<1x256xf32>
    %310 = vector.broadcast %309 : vector<1x256xf32> to vector<32x256xf32>
    %311 = arith.mulf %306, %310 : vector<32x256xf32>
    %c0_81 = arith.constant 0 : index
    %c0_82 = arith.constant 0 : index
    %312 = vector.load %arg18[%c0_81, %c0_82] : memref<32x1xf32, #tpu.memory_space<vmem>>, vector<32x1xf32>
    %313 = vector.broadcast %312 : vector<32x1xf32> to vector<32x256xf32>
    %314 = arith.mulf %311, %313 : vector<32x256xf32>
    %c0_83 = arith.constant 0 : index
    %c0_84 = arith.constant 0 : index
    %315 = vector.load %arg19[%c0_83, %c0_84] : memref<32x1xf32, #tpu.memory_space<vmem>>, vector<32x1xf32>
    %316 = vector.broadcast %315 : vector<32x1xf32> to vector<32x256xf32>
    %317 = arith.addf %314, %316 : vector<32x256xf32>
    %318 = arith.addf %279, %317 : vector<32x256xf32>
    %c0_85 = arith.constant 0 : index
    %c0_86 = arith.constant 0 : index
    %c0_87 = arith.constant 0 : index
    %319 = vector.load %arg20[%c0_85, %c0_86, %c0_87] : memref<1x32x256xf32, #tpu.memory_space<vmem>>, vector<1x32x256xf32>
    %320 = vector.shape_cast %319 : vector<1x32x256xf32> to vector<32x256xf32>
    %321 = vector.shape_cast %318 : vector<32x256xf32> to vector<1x32x256xf32>
    tpu.vector_store %arg20[%c0_85, %c0_86, %c0_87], %321 {strides = array<i32>} : memref<1x32x256xf32, #tpu.memory_space<vmem>>, vector<1x32x256xf32>,
    return
  }
  func.func @transform_0(%arg0: i32) -> (i32, i32, i32, i32) {
    %c0_i32 = arith.constant 0 : i32
    %c0_i32_0 = arith.constant 0 : i32
    %c0_i32_1 = arith.constant 0 : i32
    %c0_i32_2 = arith.constant 0 : i32
    return %arg0, %c0_i32, %c0_i32_0, %c0_i32_1 : i32, i32, i32, i32
  }
  func.func @transform_1(%arg0: i32) -> (i32, i32, i32, i32) {
    %c0_i32 = arith.constant 0 : i32
    %c0_i32_0 = arith.constant 0 : i32
    %c0_i32_1 = arith.constant 0 : i32
    %c0_i32_2 = arith.constant 0 : i32
    return %arg0, %c0_i32, %c0_i32_0, %c0_i32_1 : i32, i32, i32, i32
  }
  func.func @transform_2(%arg0: i32) -> (i32, i32, i32) {
    %c0_i32 = arith.constant 0 : i32
    %c0_i32_0 = arith.constant 0 : i32
    %c0_i32_1 = arith.constant 0 : i32
    return %arg0, %c0_i32, %c0_i32_0 : i32, i32, i32
  }
  func.func @transform_3(%arg0: i32) -> (i32, i32) {
    %c0_i32 = arith.constant 0 : i32
    %c0_i32_0 = arith.constant 0 : i32
    %c0_i32_1 = arith.constant 0 : i32
    return %c0_i32, %c0_i32_0 : i32, i32
  }
  func.func @transform_4(%arg0: i32) -> (i32, i32) {
    %c0_i32 = arith.constant 0 : i32
    %c0_i32_0 = arith.constant 0 : i32
    %c0_i32_1 = arith.constant 0 : i32
    return %c0_i32, %c0_i32_0 : i32, i32
  }
  func.func @transform_5(%arg0: i32) -> (i32, i32) {
    %c0_i32 = arith.constant 0 : i32
    %c0_i32_0 = arith.constant 0 : i32
    %c0_i32_1 = arith.constant 0 : i32
    return %c0_i32, %c0_i32_0 : i32, i32
  }
  func.func @transform_6(%arg0: i32) -> (i32, i32) {
    %c0_i32 = arith.constant 0 : i32
    %c0_i32_0 = arith.constant 0 : i32
    %c0_i32_1 = arith.constant 0 : i32
    return %c0_i32, %c0_i32_0 : i32, i32
  }
  func.func @transform_7(%arg0: i32) -> (i32, i32) {
    %c0_i32 = arith.constant 0 : i32
    %c0_i32_0 = arith.constant 0 : i32
    %c0_i32_1 = arith.constant 0 : i32
    return %c0_i32, %c0_i32_0 : i32, i32
  }
  func.func @transform_8(%arg0: i32) -> (i32, i32) {
    %c0_i32 = arith.constant 0 : i32
    %c0_i32_0 = arith.constant 0 : i32
    %c0_i32_1 = arith.constant 0 : i32
    return %c0_i32, %c0_i32_0 : i32, i32
  }
  func.func @transform_9(%arg0: i32) -> (i32, i32) {
    %c0_i32 = arith.constant 0 : i32
    %c0_i32_0 = arith.constant 0 : i32
    %c0_i32_1 = arith.constant 0 : i32
    return %c0_i32, %c0_i32_0 : i32, i32
  }
  func.func @transform_10(%arg0: i32) -> (i32, i32) {
    %c0_i32 = arith.constant 0 : i32
    %c0_i32_0 = arith.constant 0 : i32
    %c0_i32_1 = arith.constant 0 : i32
    return %c0_i32, %c0_i32_0 : i32, i32
  }
  func.func @transform_11(%arg0: i32) -> (i32, i32) {
    %c0_i32 = arith.constant 0 : i32
    %c0_i32_0 = arith.constant 0 : i32
    %c0_i32_1 = arith.constant 0 : i32
    return %c0_i32, %c0_i32_0 : i32, i32
  }
  func.func @transform_12(%arg0: i32) -> (i32, i32) {
    %c0_i32 = arith.constant 0 : i32
    %c0_i32_0 = arith.constant 0 : i32
    %c0_i32_1 = arith.constant 0 : i32
    return %c0_i32, %c0_i32_0 : i32, i32
  }
  func.func @transform_13(%arg0: i32) -> (i32, i32) {
    %c0_i32 = arith.constant 0 : i32
    %c0_i32_0 = arith.constant 0 : i32
    %c0_i32_1 = arith.constant 0 : i32
    return %c0_i32, %c0_i32_0 : i32, i32
  }
  func.func @transform_14(%arg0: i32) -> (i32, i32) {
    %c0_i32 = arith.constant 0 : i32
    %c0_i32_0 = arith.constant 0 : i32
    %c0_i32_1 = arith.constant 0 : i32
    return %c0_i32, %c0_i32_0 : i32, i32
  }
  func.func @transform_15(%arg0: i32) -> (i32, i32) {
    %c0_i32 = arith.constant 0 : i32
    %c0_i32_0 = arith.constant 0 : i32
    %c0_i32_1 = arith.constant 0 : i32
    return %c0_i32, %c0_i32_0 : i32, i32
  }
  func.func @transform_16(%arg0: i32) -> (i32, i32) {
    %c0_i32 = arith.constant 0 : i32
    %c0_i32_0 = arith.constant 0 : i32
    %c0_i32_1 = arith.constant 0 : i32
    return %c0_i32, %c0_i32_0 : i32, i32
  }
  func.func @transform_17(%arg0: i32) -> (i32, i32) {
    %c0_i32 = arith.constant 0 : i32
    %c0_i32_0 = arith.constant 0 : i32
    %c0_i32_1 = arith.constant 0 : i32
    return %c0_i32, %c0_i32_0 : i32, i32
  }
  func.func @transform_18(%arg0: i32) -> (i32, i32) {
    %c0_i32 = arith.constant 0 : i32
    %c0_i32_0 = arith.constant 0 : i32
    %c0_i32_1 = arith.constant 0 : i32
    return %c0_i32, %c0_i32_0 : i32, i32
  }
  func.func @transform_19(%arg0: i32) -> (i32, i32, i32) {
    %c0_i32 = arith.constant 0 : i32
    %c0_i32_0 = arith.constant 0 : i32
    %c0_i32_1 = arith.constant 0 : i32
    return %arg0, %c0_i32, %c0_i32_0 : i32, i32, i32
  }
}

</mosaic_0001>

<bundles_post_ra>
// kernel: ag_rope_encoder_layer.1
= control target key start
LH: loop header
LB: loop body
LE: loop exit
PB: predicated region body
PF: predicated region fallthrough
CT: control target
= control target key end

     0   :  { %s3283_s0 = inlined_call_operand.vmem [shape: f32[2,16,16,32], index: 0, kind: input, shape index: {}]   ;;  %s3284_s1 = inlined_call_operand.vmem [shape: f32[2,16,16,32], index: 1, kind: input, shape index: {}]   ;;  %s3285_s2 = inlined_call_operand.vmem [shape: f32[2,32,256], index: 2, kind: input, shape index: {}]   ;;  %s3286_s3 = inlined_call_operand.vmem [shape: f32[16,32], index: 3, kind: input, shape index: {}]   ;;  %s3287_s4 = inlined_call_operand.vmem [shape: f32[1,32], index: 4, kind: input, shape index: {}]   ;;  %s3288_s5 = inlined_call_operand.vmem [shape: f32[1,32], index: 5, kind: input, shape index: {}]   ;;  %s3289_s6 = inlined_call_operand.vmem [shape: f32[32,64], index: 6, kind: input, shape index: {}]   ;;  %s3290_s7 = inlined_call_operand.vmem [shape: f32[32,64], index: 7, kind: input, shape index: {}]   ;;  %s3291_s8 = inlined_call_operand.vmem [shape: f32[32,32], index: 8, kind: input, shape index: {}]   ;;  %s3292_s9 = inlined_call_operand.vmem [shape: f32[16,32], index: 9, kind: input, shape index: {}]   ;;  %s3293_s10 = inlined_call_operand.vmem [shape: f32[16,32], index: 10, kind: input, shape index: {}]   ;;  %s3294_s11 = inlined_call_operand.vmem [shape: f32[16,32], index: 11, kind: input, shape index: {}]   ;;  %s3295_s12 = inlined_call_operand.vmem [shape: f32[16,32], index: 12, kind: input, shape index: {}]   ;;  %s3296_s13 = inlined_call_operand.vmem [shape: f32[16,256], index: 13, kind: input, shape index: {}]   ;;  %s3297_s14 = inlined_call_operand.vmem [shape: f32[64,32], index: 14, kind: input, shape index: {}]   ;;  %s3298_s15 = inlined_call_operand.vmem [shape: f32[64,32], index: 15, kind: input, shape index: {}]   ;;  %s3299_s16 = inlined_call_operand.vmem [shape: f32[32,64], index: 16, kind: input, shape index: {}]   ;;  %s3300_s17 = inlined_call_operand.vmem [shape: f32[32,1], index: 17, kind: input, shape index: {}]   ;;  %s3301_s18 = inlined_call_operand.vmem [shape: f32[32,1], index: 18, kind: input, shape index: {}]   ;;  %s3302_s19 = inlined_call_operand.vmem [shape: f32[2,32,256], index: 19, kind: output, shape index: {}]  }
   0x1   :  { %3304 = sst [smem:[#allocation2_spill]] %s3283_s0  ;;  %s2579_s0 = smov 0  }
   0x2   :  { %3305 = sst [smem:[#allocation3_spill]] %s3284_s1 }
   0x3   :  { %3306 = sst [smem:[#allocation4_spill]] %s3285_s2 }
   0x4   :  { %3307 = sst [smem:[#allocation5_spill]] %s3286_s3 }
   0x5 LB: > { %s2274_s30 = sadd.s32 4294967295, %s2467_s0   ;;  %p2278_p0 = scmp.ge.s32.totalorder %s2467_s0, 1  ;;  %s2467_s0 = sphi %s2579_s0, %s29_s0  }
   0x6   : > { %p557_p1 = scmp.lt.s32.totalorder %s2467_s0, 3 }
   0x8   : > { %p558_p2 = pnand %p2278_p0, %p557_p1 }
   0x9   : > { %p623_p3 = scmp.lt.s32.totalorder (!%p558_p2), %s2274_s30, 1  ;;  %s3308_s1 = sld [smem:[#allocation5_spill]] (!%p558_p2) }
   0xa   : > { %561 = sbr.rel (%p558_p2) target bundleno = 1923 (0x783), region = 96  ;;  %s3309_s24 = sld [smem:[#allocation3_spill]] (!%p558_p2) }
   0xb   : > { %s3310_s29 = sld [smem:[#allocation2_spill]] (!%p558_p2)  ;;  %s2471_s2 = smov (!%p558_p2), 96  }
   0xc   : > { %s2473_s28 = smov (!%p558_p2), 112   ;;  %s2477_s23 = smov (!%p558_p2), 24  }
   0xf   : > { %s3313_s30 = smov (!%p623_p3, %s2274_s30), 1  ;;  %v2592_v0 = vld [vmem:[%s3308_s1] sm:$0xff]  ;;  %v2603_v1 = vld [vmem:[%s3308_s1 + $0x8] sm:$0xff]  ;;  %vm757_vm0 = vcmask 261120   ;;  %vm1074_vm14 = vcmask 64512   ;;  %vm1112_vm15 = vcmask 130048  }
  0x10   : > { %s2369_s22 = sshll.u32 %s3313_s30, 8  ;;  %v677_v2 = vperm.slane %v2592_v0, 0  ;;  %v680_v3 = vperm.slane %v2592_v0, 1  ;;  %v683_v7 = vperm.slane %v2592_v0, 2  ;;  %v686_v8 = vperm.slane %v2592_v0, 3 }
  0x11   : > { %s2598_s25 = scalar_lea.vmem %s3309_s24, %s2369_s22  ;;  %v689_v9 = vperm.slane %v2592_v0, 4  ;;  %v692_v14 = vperm.slane %v2592_v0, 5  ;;  %v695_v15 = vperm.slane %v2592_v0, 6  ;;  %v698_v16 = vperm.slane %v2592_v0, 7  ;;  %s2625_s20 = scalar_lea.vmem %s3310_s29, %s2369_s22 }
  0x12   : > { %v819_v4 = vld [vmem:[%s2598_s25] sm:$0xff]  ;;  %v821_v5 = vld [vmem:[%s2598_s25 + $0x10] sm:$0xff]  ;;  %v701_v22 = vperm.slane %v2603_v1, 0  ;;  %v704_v23 = vperm.slane %v2603_v1, 1  ;;  %v707_v28 = vperm.slane %v2603_v1, 2  ;;  %v710_v29 = vperm.slane %v2603_v1, 3 }
  0x13   : > { %v823_v6 = vld [vmem:[%s2598_s25 + $0x20] sm:$0xff]  ;;  %v825_v10 = vld [vmem:[%s2598_s25 + $0x30] sm:$0xff]  ;;  %v851_v13 = vmax.f32 %v819_v4, %v821_v5  ;;  %v713_v30 = vperm.slane %v2603_v1, 4  ;;  %v716_v37 = vperm.slane %v2603_v1, 5  ;;  %v719_v43 = vperm.slane %v2603_v1, 6  ;;  %s2470_s29 = smov 32  }
  0x14   : > { %v827_v11 = vld [vmem:[%s2598_s25 + $0x40] sm:$0xff]  ;;  %v829_v12 = vld [vmem:[%s2598_s25 + $0x50] sm:$0xff]  ;;  %v853_v20 = vmax.f32 %v823_v6, %v825_v10  ;;  %v722_v44 = vperm.slane %v2603_v1, 7  ;;  %s2472_s24 = smov 120  }
  0x15   : > { %v831_v17 = vld [vmem:[%s2598_s25 + $0x60] sm:$0xff]  ;;  %v833_v18 = vld [vmem:[%s2598_s25 + $0x70] sm:$0xff]  ;;  %v855_v21 = vmax.f32 %v827_v11, %v829_v12 }
  0x16   : > { %v835_v19 = vld [vmem:[%s2598_s25 + $0x80] sm:$0xff]  ;;  %v837_v24 = vld [vmem:[%s2598_s25 + $0x90] sm:$0xff]  ;;  %v857_v27 = vmax.f32 %v831_v17, %v833_v18  ;;  %v867_v36 = vmax.f32 %v851_v13, %v853_v20 }
  0x17   : > { %v839_v25 = vld [vmem:[%s2598_s25 + $0xa0] sm:$0xff]  ;;  %v841_v26 = vld [vmem:[%s2598_s25 + $0xb0] sm:$0xff]  ;;  %v859_v34 = vmax.f32 %v835_v19, %v837_v24 }
  0x18   : > { %v843_v31 = vld [vmem:[%s2598_s25 + $0xc0] sm:$0xff]  ;;  %v845_v32 = vld [vmem:[%s2598_s25 + $0xd0] sm:$0xff]  ;;  %v861_v35 = vmax.f32 %v839_v25, %v841_v26  ;;  %v869_v40 = vmax.f32 %v855_v21, %v857_v27  ;;  %v820_v27 = vld [vmem:[%s2598_s25 + $0x8] sm:$0xff] }
  0x19   : > { %v847_v33 = vld [vmem:[%s2598_s25 + $0xe0] sm:$0xff]  ;;  %v849_v38 = vld [vmem:[%s2598_s25 + $0xf0] sm:$0xff]  ;;  %v863_v39 = vmax.f32 %v843_v31, %v845_v32 }
  0x1a   : > { %v643_v41 = vld [vmem:[%s2625_s20] sm:$0xff]  ;;  %v645_v42 = vld [vmem:[%s2625_s20 + $0x10] sm:$0xff]  ;;  %v865_v45 = vmax.f32 %v847_v33, %v849_v38  ;;  %v871_v46 = vmax.f32 %v859_v34, %v861_v35  ;;  %v875_v52 = vmax.f32 %v867_v36, %v869_v40  ;;  %v822_v35 = vld [vmem:[%s2598_s25 + $0x18] sm:$0xff] }
  0x1b   : > { %v647_v47 = vld [vmem:[%s2625_s20 + $0x20] sm:$0xff]  ;;  %v649_v48 = vld [vmem:[%s2625_s20 + $0x30] sm:$0xff]  ;;  %v678_v50 = vmul.f32 %v677_v2, %v643_v41  ;;  %v681_v51 = vmul.f32 %v680_v3, %v645_v42  ;;  %v824_v36 = vld [vmem:[%s2598_s25 + $0x28] sm:$0xff] }
  0x1c   : > { %v651_v49 = vld [vmem:[%s2625_s20 + $0x40] sm:$0xff]  ;;  %v653_v53 = vld [vmem:[%s2625_s20 + $0x50] sm:$0xff]  ;;  %v684_v56 = vmul.f32 %v683_v7, %v647_v47  ;;  %v687_v57 = vmul.f32 %v686_v8, %v649_v48  ;;  %v873_v59 = vmax.f32 %v863_v39, %v865_v45  ;;  %v826_v38 = vld [vmem:[%s2598_s25 + $0x38] sm:$0xff] }
  0x1d   : > { %v655_v54 = vld [vmem:[%s2625_s20 + $0x60] sm:$0xff]  ;;  %v657_v55 = vld [vmem:[%s2625_s20 + $0x70] sm:$0xff]  ;;  %v690_v58 = vmul.f32 %v689_v9, %v651_v49  ;;  %v693_v63 = vmul.f32 %v692_v14, %v653_v53  ;;  %v725_v18 = vadd.f32 %v681_v51, %v678_v50  ;;  %v828_v45 = vld [vmem:[%s2598_s25 + $0x48] sm:$0xff] }
  0x1e   : > { %v659_v60 = vld [vmem:[%s2625_s20 + $0x80] sm:$0xff]  ;;  %v661_v61 = vld [vmem:[%s2625_s20 + $0x90] sm:$0xff]  ;;  %v696_v4 = vmul.f32 %v695_v15, %v655_v54  ;;  %v699_v5 = vmul.f32 %v698_v16, %v657_v55  ;;  %v877_v19 = vmax.f32 %v871_v46, %v873_v59  ;;  %v727_v33 = vadd.f32 %v687_v57, %v684_v56  ;;  %v830_v46 = vld [vmem:[%s2598_s25 + $0x58] sm:$0xff] }
  0x1f   : > { %v663_v62 = vld [vmem:[%s2625_s20 + $0xa0] sm:$0xff]  ;;  %v665_v6 = vld [vmem:[%s2625_s20 + $0xb0] sm:$0xff]  ;;  %v702_v12 = vmul.f32 %v701_v22, %v659_v60  ;;  %v705_v13 = vmul.f32 %v704_v23, %v661_v61  ;;  %v729_v34 = vadd.f32 %v693_v63, %v690_v58  ;;  %v832_v47 = vld [vmem:[%s2598_s25 + $0x68] sm:$0xff]  ;;  %v854_v61 = vmax.f32 %v824_v36, %v826_v38 }
  0x20   : > { %v667_v10 = vld [vmem:[%s2625_s20 + $0xc0] sm:$0xff]  ;;  %v669_v11 = vld [vmem:[%s2625_s20 + $0xd0] sm:$0xff]  ;;  %v708_v17 = vmul.f32 %v707_v28, %v663_v62  ;;  %v711_v24 = vmul.f32 %v710_v29, %v665_v6  ;;  %v2694_v39 = vmax.f32 %v875_v52, %v877_v19  ;;  %v731_v40 = vadd.f32 %v699_v5, %v696_v4  ;;  %v834_v51 = vld [vmem:[%s2598_s25 + $0x78] sm:$0xff] }
  0x21   : > { %v671_v20 = vld [vmem:[%s2625_s20 + $0xe0] sm:$0xff]  ;;  %v673_v21 = vld [vmem:[%s2625_s20 + $0xf0] sm:$0xff]  ;;  %v714_v25 = vmul.f32 %v713_v30, %v667_v10  ;;  %v717_v26 = vmul.f32 %v716_v37, %v669_v11  ;;  %v733_v41 = vadd.f32 %v705_v13, %v702_v12  ;;  %v741_v50 = vadd.f32 %v727_v33, %v725_v18  ;;  %v836_v53 = vld [vmem:[%s2598_s25 + $0x88] sm:$0xff] }
  0x22   : > { %v720_v31 = vmul.f32 %v719_v43, %v671_v20  ;;  %v723_v32 = vmul.f32 %v722_v44, %v673_v21  ;;  %v735_v42 = vadd.f32 %v711_v24, %v708_v17  ;;  %v838_v54 = vld [vmem:[%s2598_s25 + $0x98] sm:$0xff]  ;;  %v852_v52 = vmax.f32 %v820_v27, %v822_v35  ;;  %v840_v58 = vld [vmem:[%s2598_s25 + $0xa8] sm:$0xff] }
  0x23   : > { %v737_v48 = vadd.f32 %v717_v26, %v714_v25  ;;  %v881_v55 = vsel %vm757_vm0, %v2694_v39, 0.0  ;;  %v743_v56 = vadd.f32 %v731_v40, %v729_v34  ;;  %v842_v59 = vld [vmem:[%s2598_s25 + $0xb8] sm:$0xff]  ;;  %v844_v60 = vld [vmem:[%s2598_s25 + $0xc8] sm:$0xff]  ;;  %v856_v6 = vmax.f32 %v828_v45, %v830_v46 }
  0x24   : > { %v739_v49 = vadd.f32 %v723_v32, %v720_v31  ;;  %v745_v57 = vadd.f32 %v735_v42, %v733_v41  ;;  %882 = vadd.xlane.f32.xlu0 %v881_v55  ;;  %v846_v63 = vld [vmem:[%s2598_s25 + $0xd8] sm:$0xff]  ;;  %v848_v4 = vld [vmem:[%s2598_s25 + $0xe8] sm:$0xff]  ;;  %v858_v10 = vmax.f32 %v832_v47, %v834_v51  ;;  %v860_v11 = vmax.f32 %v836_v53, %v838_v54 }
  0x25   : > { %v850_v5 = vld [vmem:[%s2598_s25 + $0xf8] sm:$0xff]  ;;  %v749_v12 = vadd.f32 %v743_v56, %v741_v50  ;;  %v862_v13 = vmax.f32 %v840_v58, %v842_v59  ;;  %v864_v17 = vmax.f32 %v844_v60, %v846_v63  ;;  %v644_v19 = vld [vmem:[%s2625_s20 + $0x8] sm:$0xff]  ;;  %v868_v25 = vmax.f32 %v852_v52, %v854_v61 }
  0x26   : > { %v747_v62 = vadd.f32 %v739_v49, %v737_v48  ;;  %v866_v18 = vmax.f32 %v848_v4, %v850_v5  ;;  %v646_v20 = vld [vmem:[%s2625_s20 + $0x18] sm:$0xff]  ;;  %v648_v21 = vld [vmem:[%s2625_s20 + $0x28] sm:$0xff]  ;;  %v870_v26 = vmax.f32 %v856_v6, %v858_v10  ;;  %v679_v33 = vmul.f32 %v677_v2, %v644_v19 }
  0x27   : > { %v650_v27 = vld [vmem:[%s2625_s20 + $0x38] sm:$0xff]  ;;  %v652_v31 = vld [vmem:[%s2625_s20 + $0x48] sm:$0xff]  ;;  %v872_v34 = vmax.f32 %v860_v11, %v862_v13  ;;  %v682_v41 = vmul.f32 %v680_v3, %v646_v20  ;;  %v685_v42 = vmul.f32 %v683_v7, %v648_v21 }
  0x28   : > { %v751_v24 = vadd.f32 %v747_v62, %v745_v57  ;;  %v654_v32 = vld [vmem:[%s2625_s20 + $0x58] sm:$0xff]  ;;  %v874_v35 = vmax.f32 %v864_v17, %v866_v18  ;;  %v656_v36 = vld [vmem:[%s2625_s20 + $0x68] sm:$0xff]  ;;  %v876_v46 = vmax.f32 %v868_v25, %v870_v26  ;;  %v688_v49 = vmul.f32 %v686_v8, %v650_v27 }
  0x29   : > { %v658_v38 = vld [vmem:[%s2625_s20 + $0x78] sm:$0xff]  ;;  %v660_v40 = vld [vmem:[%s2625_s20 + $0x88] sm:$0xff]  ;;  %v691_v50 = vmul.f32 %v689_v9, %v652_v31  ;;  %v694_v3 = vmul.f32 %v692_v14, %v654_v32  ;;  %v697_v7 = vmul.f32 %v695_v15, %v656_v36  ;;  %v726_v59 = vadd.f32 %v682_v41, %v679_v33 }
  0x2a   : > { %v753_v45 = vadd.f32 %v751_v24, %v749_v12  ;;  %v662_v47 = vld [vmem:[%s2625_s20 + $0x98] sm:$0xff]  ;;  %v664_v48 = vld [vmem:[%s2625_s20 + $0xa8] sm:$0xff]  ;;  %v878_v51 = vmax.f32 %v872_v34, %v874_v35  ;;  %v700_v55 = vmul.f32 %v698_v16, %v658_v38  ;;  %v703_v8 = vmul.f32 %v701_v22, %v660_v40 }
  0x2b   : > { %v666_v2 = vld [vmem:[%s2625_s20 + $0xb8] sm:$0xff]  ;;  %v668_v53 = vld [vmem:[%s2625_s20 + $0xc8] sm:$0xff]  ;;  %v706_v9 = vmul.f32 %v704_v23, %v662_v47  ;;  %v709_v58 = vmul.f32 %v707_v28, %v664_v48  ;;  %v728_v60 = vadd.f32 %v688_v49, %v685_v42  ;;  %v730_v61 = vadd.f32 %v694_v3, %v691_v50 }
  0x2c   : > { %v670_v54 = vld [vmem:[%s2625_s20 + $0xd8] sm:$0xff]  ;;  %v672_v52 = vld [vmem:[%s2625_s20 + $0xe8] sm:$0xff]  ;;  %v758_v56 = vsel %vm757_vm0, %v753_v45, 0.0  ;;  %v880_v14 = vmax.f32 %v876_v46, %v878_v51  ;;  %v712_v15 = vmul.f32 %v710_v29, %v666_v2  ;;  %v715_v0 = vmul.f32 %v713_v30, %v668_v53  ;;  %v964_v53 = vld [vmem:[%s3290_s7 + $0x10] sm:$0xff] }
  0x2d   : > { %v674_v57 = vld [vmem:[%s2625_s20 + $0xf8] sm:$0xff]  ;;  %759 = vadd.xlane.f32.xlu1 %v758_v56  ;;  %v718_v16 = vmul.f32 %v716_v37, %v670_v54  ;;  %v721_v22 = vmul.f32 %v719_v43, %v672_v52  ;;  %v732_v62 = vadd.f32 %v700_v55, %v697_v7  ;;  %v734_v63 = vadd.f32 %v706_v9, %v703_v8  ;;  %v931_v52 = vld [vmem:[%s3289_s6 + $0x10] sm:$0xff]  ;;  %v963_v3 = vld [vmem:[%s3290_s7 + $0x8] sm:$0xff]  ;;  %s2474_s20 = smov 104  }
  0x2e   : > { %v724_v23 = vmul.f32 %v722_v44, %v674_v57  ;;  %v884_v28 = vsel %vm757_vm0, %v880_v14, 0.0  ;;  %v736_v29 = vadd.f32 %v712_v15, %v709_v58  ;;  %v742_v5 = vadd.f32 %v728_v60, %v726_v59  ;;  %v965_v49 = vld [vmem:[%s3290_s7 + $0x18] sm:$0xff]  ;;  %v930_v55 = vld [vmem:[%s3289_s6 + $0x8] sm:$0xff]  ;;  %v962_v56 = vld [vmem:[%s3290_s7] sm:$0xff] }
  0x2f   : > { %885 = vadd.xlane.f32.xlu0 %v884_v28  ;;  %v738_v4 = vadd.f32 %v718_v16, %v715_v0  ;;  %v744_v6 = vadd.f32 %v732_v62, %v730_v61  ;;  %v2469_v44 = vmov 32.0   ;;  %984 = vmatpush.msra.mxu1 %v965_v49  ;;  %v932_v51 = vld [vmem:[%s3289_s6 + $0x18] sm:$0xff]  ;;  %v929_v57 = vld [vmem:[%s3289_s6] sm:$0xff]  ;;  %v997_v61 = vld [vmem:[%s3291_s8 + $0x10] sm:$0xff] }
  0x30   : > { %v740_v30 = vadd.f32 %v724_v23, %v721_v22  ;;  %v746_v37 = vadd.f32 %v736_v29, %v734_v63  ;;  %2415 = vrcp.f32 %v2469_v44  ;;  %951 = vmatpush.msra.mxu0 %v932_v51  ;;  %2373 = vmatpush.msra.mxu2 %v932_v51  ;;  %v998_v60 = vld [vmem:[%s3291_s8 + $0x18] sm:$0xff]  ;;  %v1052_v28 = vld [vmem:[%s3295_s12] sm:$0xff] }
  0x31   : > { %v750_v11 = vadd.f32 %v744_v6, %v742_v5  ;;  %985 = vmatpush.msra.mxu1 %v964_v53  ;;  %v1026_v62 = vld [vmem:[%s3293_s10] sm:$0xff]  ;;  %v1027_v53 = vld [vmem:[%s3293_s10 + $0x8] sm:$0xff] }
  0x32   : > { %v748_v10 = vadd.f32 %v740_v30, %v738_v4  ;;  %952 = vmatpush.msra.mxu0 %v931_v52  ;;  %2374 = vmatpush.msra.mxu2 %v931_v52  ;;  %v996_v4 = vld [vmem:[%s3291_s8 + $0x8] sm:$0xff] }
  0x33   : > { %986 = vmatpush.msra.mxu1 %v963_v3 }
  0x34   : > { %v752_v43 = vadd.f32 %v748_v10, %v746_v37  ;;  %953 = vmatpush.msra.mxu0 %v930_v55  ;;  %2375 = vmatpush.msra.mxu2 %v930_v55  ;;  %v995_v10 = vld [vmem:[%s3291_s8] sm:$0xff] }
  0x35   : > { %987 = vmatpush.msra.mxu1 %v962_v56 }
  0x36   : > { %v754_v12 = vadd.f32 %v752_v43, %v750_v11  ;;  %v2416_v13 = vpop.eup %2415  ;;  %954 = vmatpush.msra.mxu0 %v929_v57  ;;  %2376 = vmatpush.msra.mxu2 %v929_v57 }
  0x37   : > { %v765_v17 = vmul.f32 32.0, %v2416_v13  ;;  %vm769_vm1 = vweird.f32 %v2416_v13 }
  0x38   : > { %v761_v1 = vsel %vm757_vm0, %v754_v12, 0.0  ;;  %1011 = vmatpush.msrb.mxu2 %v998_v60  ;;  %v1048_v60 = vld [vmem:[%s3294_s11] sm:$0xff] }
  0x39   : > { %762 = vadd.xlane.f32.xlu1 %v761_v1  ;;  %v766_v18 = vsub.f32 1.0, %v765_v17 }
  0x3a   : > { %1012 = vmatpush.msrb.mxu2 %v997_v61 }
  0x3b   : > { %v767_v19 = vmul.f32 %v2416_v13, %v766_v18  ;;  %v2414_v18 = vld [vmem:[%s3288_s5] ss:$0 sm:$0xff] }
  0x3c   : > { %1013 = vmatpush.msrb.mxu2 %v996_v4  ;;  %v1049_v4 = vld [vmem:[%s3294_s11 + $0x8] sm:$0xff] }
  0x3d   : > { %v768_v20 = vadd.f32 %v2416_v13, %v767_v19 }
  0x3e   : > { %1014 = vmatpush.msrb.mxu2 %v995_v10 }
  0x3f   : > { %v2761_v21 = vsel %vm769_vm1, %v2416_v13, %v768_v20 }
  0x97   : > { %v883_v24 = vpop.xlane.xlu0 %882 }
  0x98   : > { %v887_v25 = vmul.f32 %v883_v24, %v2761_v21 }
  0x9a   : > { %v2765_v26 = vsub.f32 %v2694_v39, %v887_v25 }
  0x9c   : > { %v891_v27 = vmul.f32 %v2765_v26, %v2765_v26 }
  0x9e   : > { %v893_v32 = vsel %vm757_vm0, %v891_v27, 0.0 }
  0x9f   : > { %894 = vadd.xlane.f32.xlu2 %v893_v32 }
  0xa0   : > { %v760_v31 = vpop.xlane.xlu1 %759 }
  0xa1   : > { %v771_v33 = vmul.f32 %v2761_v21, %v760_v31 }
  0xa2   : > { %v886_v35 = vpop.xlane.xlu0 %885 }
  0xa3   : > { %v2771_v34 = vsub.f32 %v753_v45, %v771_v33  ;;  %v888_v36 = vmul.f32 %v886_v35, %v2761_v21 }
  0xa5   : > { %v775_v38 = vmul.f32 %v2771_v34, %v2771_v34  ;;  %v2776_v40 = vsub.f32 %v880_v14, %v888_v36 }
  0xa7   : > { %v777_v39 = vsel %vm757_vm0, %v775_v38, 0.0  ;;  %v892_v41 = vmul.f32 %v2776_v40, %v2776_v40 }
  0xa8   : > { %778 = vadd.xlane.f32.xlu0 %v777_v39 }
  0xa9   : > { %v896_v42 = vsel %vm757_vm0, %v892_v41, 0.0 }
  0xaa   : > { %897 = vadd.xlane.f32.xlu2 %v896_v42 }
  0xac   : > { %v763_v46 = vpop.xlane.xlu1 %762 }
  0xad   : > { %v772_v45 = vmul.f32 %v2761_v21, %v763_v46  ;;  %v1053_v46 = vld [vmem:[%s3295_s12 + $0x8] sm:$0xff] }
  0xaf   : > { %v2783_v47 = vsub.f32 %v754_v12, %v772_v45  ;;  %v2413_v12 = vld [vmem:[%s3287_s4] ss:$0 sm:$0xff] }
  0xb1   : > { %v776_v48 = vmul.f32 %v2783_v47, %v2783_v47 }
  0xb3   : > { %v780_v2 = vsel %vm757_vm0, %v776_v48, 0.0 }
  0xb4   : > { %781 = vadd.xlane.f32.xlu1 %v780_v2 }
  0xbc   : > { %1056 = vrot.lane.b32.xlu0 %v1052_v28, %s2470_s29 }
  0xc2   : > { %1058 = vrot.lane.b32.xlu2 %v1053_v46, %s2470_s29 }
  0xca   : > { %1032 = vrot.lane.b32.xlu2 %v1027_v53, %s2470_s29 }
  0xcd   : > { %1030 = vrot.lane.b32.xlu1 %v1026_v62, %s2470_s29  ;;  %s2476_s29 = smov 16  }
 0x112   : > { %v895_v50 = vpop.xlane.xlu2 %894 }
 0x113   : > { %v899_v54 = vmul.f32 %v895_v50, %v2761_v21 }
 0x115   : > { %v901_v7 = vadd.f32 1e-05, %v899_v54 }
 0x117   : > { %2417 = vrsqrt.f32 %v901_v7  ;;  %vm909_vm3 = vweird.f32 %v901_v7 }
 0x11b   : > { %v779_v8 = vpop.xlane.xlu0 %778 }
 0x11c   : > { %v783_v9 = vmul.f32 %v779_v8, %v2761_v21 }
 0x11d   : > { %v898_v14 = vpop.xlane.xlu2 %897  ;;  %v2418_v15 = vpop.eup %2417 }
 0x11e   : > { %v785_v58 = vadd.f32 1e-05, %v783_v9  ;;  %v900_v0 = vmul.f32 %v898_v14, %v2761_v21  ;;  %v904_v16 = vmul.f32 %v2418_v15, %v901_v7  ;;  %vm910_vm2 = vweird.f32 %v2418_v15 }
 0x11f   : > { %vm911_vm4 = vmor %vm909_vm3, %vm910_vm2 }
 0x120   : > { %2419 = vrsqrt.f32 %v785_v58  ;;  %v902_v22 = vadd.f32 1e-05, %v900_v0  ;;  %v905_v23 = vmul.f32 %v2418_v15, %v904_v16  ;;  %vm793_vm6 = vweird.f32 %v785_v58 }
 0x122   : > { %2421 = vrsqrt.f32 %v902_v22  ;;  %v906_v59 = vmul.f32 0.5, %v905_v23  ;;  %vm919_vm9 = vweird.f32 %v902_v22 }
 0x124   : > { %v907_v29 = vsub.f32 1.5, %v906_v59 }
 0x125   : > { %v1059_v14 = vpop.permute.xlu2 %1058 }
 0x126   : > { %v2420_v63 = vpop.eup %2419  ;;  %v908_v6 = vmul.f32 %v2418_v15, %v907_v29 }
 0x127   : > { %v788_v30 = vmul.f32 %v2420_v63, %v785_v58  ;;  %v782_v5 = vpop.xlane.xlu1 %781  ;;  %vm794_vm5 = vweird.f32 %v2420_v63 }
 0x128   : > { %v784_v37 = vmul.f32 %v782_v5, %v2761_v21  ;;  %v2422_v11 = vpop.eup %2421  ;;  %v912_v1 = vsel %vm911_vm4, %v2418_v15, %v908_v6  ;;  %vm795_vm7 = vmor %vm793_vm6, %vm794_vm5 }
 0x129   : > { %v789_v43 = vmul.f32 %v2420_v63, %v788_v30  ;;  %v914_v44 = vmul.f32 %v2422_v11, %v902_v22  ;;  %v923_v19 = vmul.f32 %v912_v1, %v2765_v26  ;;  %vm920_vm8 = vweird.f32 %v2422_v11 }
 0x12a   : > { %v786_v13 = vadd.f32 1e-05, %v784_v37  ;;  %vm921_vm10 = vmor %vm919_vm9, %vm920_vm8 }
 0x12b   : > { %v790_v17 = vmul.f32 0.5, %v789_v43  ;;  %v915_v20 = vmul.f32 %v2422_v11, %v914_v44  ;;  %v925_v25 = vmul.f32 %v2413_v12, %v923_v19 }
 0x12c   : > { %2423 = vrsqrt.f32 %v786_v13  ;;  %vm803_vm11 = vweird.f32 %v786_v13 }
 0x12d   : > { %v791_v24 = vsub.f32 1.5, %v790_v17  ;;  %v916_v27 = vmul.f32 0.5, %v915_v20  ;;  %v927_v32 = vadd.f32 %v2414_v18, %v925_v25  ;;  %v1033_v0 = vpop.permute.xlu2 %1032 }
 0x12e   : > { %v1057_v55 = vpop.permute.xlu0 %1056 }
 0x12f   : > { %v792_v31 = vmul.f32 %v2420_v63, %v791_v24  ;;  %v917_v33 = vsub.f32 1.5, %v916_v27  ;;  %2289 = vmatmul.msk.f32.vlgmr.msra.gmra.mxu1 %vm757_vm0, %v927_v32 }
 0x131   : > { %v796_v35 = vsel %vm795_vm7, %v2420_v63, %v792_v31  ;;  %v918_v38 = vmul.f32 %v2422_v11, %v917_v33  ;;  %v1022_v63 = vld [vmem:[%s3292_s9] sm:$0xff] }
 0x132   : > { %v2424_v36 = vpop.eup %2423  ;;  %v807_v26 = vmul.f32 %v796_v35, %v2771_v34 }
 0x133   : > { %v798_v39 = vmul.f32 %v2424_v36, %v786_v13  ;;  %v922_v41 = vsel %vm921_vm10, %v2422_v11, %v918_v38  ;;  %vm804_vm12 = vweird.f32 %v2424_v36  ;;  %v1023_v11 = vld [vmem:[%s3292_s9 + $0x8] sm:$0xff] }
 0x134   : > { %v812_v42 = vmul.f32 %v2413_v12, %v807_v26  ;;  %v924_v48 = vmul.f32 %v922_v41, %v2776_v40  ;;  %vm805_vm13 = vmor %vm803_vm11, %vm804_vm12 }
 0x135   : > { %v799_v45 = vmul.f32 %v2424_v36, %v798_v39 }
 0x136   : > { %v817_v2 = vadd.f32 %v2414_v18, %v812_v42  ;;  %v926_v50 = vmul.f32 %v2413_v12, %v924_v48 }
 0x137   : > { %v800_v49 = vmul.f32 0.5, %v799_v45 }
 0x138   : > { %2287 = vmatmul.msk.f32.vlgmr.msra.gmra.mxu0 %vm757_vm0, %v817_v2  ;;  %v928_v34 = vadd.f32 %v2414_v18, %v926_v50 }
 0x139   : > { %v801_v51 = vsub.f32 1.5, %v800_v49 }
 0x13a   : > { %2290 = vmatmul.msk.f32.gmra.mxu1 %vm757_vm0, %v928_v34 }
 0x13b   : > { %v802_v54 = vmul.f32 %v2424_v36, %v801_v51 }
 0x13d   : > { %v806_v40 = vsel %vm805_vm13, %v2424_v36, %v802_v54 }
 0x13e   : > { %v808_v52 = vmul.f32 %v806_v40, %v2783_v47 }
 0x13f   : > { %v1031_v8 = vpop.permute.xlu1 %1030 }
 0x140   : > { %v813_v3 = vmul.f32 %v2413_v12, %v808_v52 }
 0x142   : > { %v818_v7 = vadd.f32 %v2414_v18, %v813_v3 }
 0x144   : > { %2288 = vmatmul.msk.f32.vlgmr.msra.gmra.mxu2 %vm757_vm0, %v818_v7 }
 0x14c   : > { %2291 = vmatmul.msk.f32.vlgmr.msrb.gmra.mxu2 %vm757_vm0, %v927_v32 }
 0x154   : > { %2292 = vmatmul.msk.f32.gmra.mxu2 %vm757_vm0, %v928_v34 }
 0x1ac   : > { %v989_v56 = vpop.f32.mrf.mxu1 }
 0x1ad   : > { %v1062_v57 = vmul.f32 %v1057_v55, %v989_v56  ;;  %v1050_v28 = vmul.f32 %v1048_v60, %v989_v56 }
 0x1af   : > { %1066 = vrot.lane.b32.xlu2 %v1062_v57, %s2471_s2 }
 0x1b5   : > { %v956_v9 = vpop.f32.mrf.mxu0 }
 0x1b6   : > { %v1036_v58 = vmul.f32 %v1031_v8, %v956_v9  ;;  %v1024_v29 = vmul.f32 %v1022_v63, %v956_v9 }
 0x1b7   : > { %v992_v15 = vpop.f32.mrf.mxu1 }
 0x1b8   : > { %1040 = vrot.lane.b32.xlu1 %v1036_v58, %s2471_s2  ;;  %v1063_v47 = vmul.f32 %v1059_v14, %v992_v15  ;;  %v1051_v6 = vmul.f32 %v1049_v4, %v992_v15 }
 0x1ba   : > { %1068 = vrot.lane.b32.xlu0 %v1063_v47, %s2471_s2 }
 0x1c7   : > { %v959_v16 = vpop.f32.mrf.mxu2 }
 0x1c8   : > { %v1037_v22 = vmul.f32 %v1033_v0, %v959_v16  ;;  %v1025_v43 = vmul.f32 %v1023_v11, %v959_v16 }
 0x1ca   : > { %1042 = vrot.lane.b32.xlu0 %v1037_v22, %s2471_s2  ;;  %s2475_s2 = smov 8  }
 0x1cf   : > { %v2860_v23 = vpop.f32.mrf.mxu2 }
 0x1d7   : > { %v2862_v59 = vpop.f32.mrf.mxu2 }
 0x1d8   : > { %1181 = vmatpush.msrb.mxu0 %v2862_v59 }
 0x1da   : > { %1182 = vmatpush.msrb.mxu0 %v2860_v23 }
 0x209   : > { %v1067_v61 = vpop.permute.xlu2 %1066 }
 0x20a   : > { %v1072_v62 = vadd.f32 %v1067_v61, %v1050_v28 }
 0x20c   : > { %1194 = vrot.lane.b32.xlu1 %v1072_v62, %s2472_s24 }
 0x22a   : > { %v1041_v30 = vpop.permute.xlu1 %1040 }
 0x22b   : > { %v1046_v5 = vadd.f32 %v1041_v30, %v1024_v29 }
 0x22c   : > { %v1069_v37 = vpop.permute.xlu0 %1068 }
 0x22d   : > { %1190 = vrot.lane.b32.xlu0 %v1046_v5, %s2472_s24  ;;  %v1073_v10 = vadd.f32 %v1069_v37, %v1051_v6 }
 0x22f   : > { %1196 = vrot.lane.b32.xlu2 %v1073_v10, %s2472_s24  ;;  %2293 = vmatpush.xpose.msk.msra.mxu2 %vm1074_vm14, %v1073_v10 }
 0x230   : > { %1322 = vrot.lane.b32.xlu1 %v1073_v10, %s2473_s28 }
 0x233   : > { %2294 = vmatpush.xpose.msk.msra.mxu2 %vm1074_vm14, %v1072_v62 }
 0x235   : > { %1446 = vrot.lane.b32.xlu0 %v1073_v10, %s2474_s20 }
 0x236   : > { %2295 = vmatmul.msk.f32.vlgmr.msra.gmra.mxu2 %vm1074_vm14, %v1046_v5 }
 0x237   : > { %1320 = vrot.lane.b32.xlu2 %v1072_v62, %s2473_s28 }
 0x238   : > { %1444 = vrot.lane.b32.xlu1 %v1072_v62, %s2474_s20 }
 0x23c   : > { %v1043_v12 = vpop.permute.xlu0 %1042 }
 0x23d   : > { %v1047_v1 = vadd.f32 %v1043_v12, %v1025_v43  ;;  %1316 = vrot.lane.b32.xlu0 %v1046_v5, %s2473_s28 }
 0x23f   : > { %2296 = vmatmul.msk.f32.gmra.mxu2 %vm1074_vm14, %v1047_v1  ;;  %1192 = vrot.lane.b32.xlu2 %v1047_v1, %s2472_s24 }
 0x240   : > { %1318 = vrot.lane.b32.xlu1 %v1047_v1, %s2473_s28 }
 0x245   : > { %1442 = vrot.lane.b32.xlu0 %v1047_v1, %s2474_s20 }
 0x247   : > { %1440 = vrot.lane.b32.xlu2 %v1046_v5, %s2474_s20 }
 0x27e   : > { %v1195_v13 = vpop.permute.xlu1 %1194 }
 0x289   : > { %v1197_v44 = vpop.permute.xlu2 %1196 }
 0x28a   : > { %2299 = vmatpush.xpose.msk.msrb.mxu1 %vm1074_vm14, %v1197_v44 }
 0x28e   : > { %2300 = vmatpush.xpose.msk.msrb.mxu1 %vm1074_vm14, %v1195_v13 }
 0x291   : > { %v1321_v17 = vpop.permute.xlu2 %1320 }
 0x299   : > { %v1193_v20 = vpop.permute.xlu2 %1192 }
 0x29f   : > { %v1191_v18 = vpop.permute.xlu0 %1190 }
 0x2a0   : > { %2301 = vmatmul.msk.f32.vlgmr.msrb.gmra.mxu1 %vm1074_vm14, %v1191_v18 }
 0x2a1   : > { %v1441_v27 = vpop.permute.xlu2 %1440 }
 0x2a2   : > { %v1323_v19 = vpop.permute.xlu1 %1322 }
 0x2a3   : > { %2305 = vmatpush.xpose.msk.msra.mxu3 %vm1074_vm14, %v1323_v19 }
 0x2a7   : > { %v1447_v24 = vpop.permute.xlu0 %1446  ;;  %2306 = vmatpush.xpose.msk.msra.mxu3 %vm1074_vm14, %v1321_v17 }
 0x2a8   : > { %2302 = vmatmul.msk.f32.gmra.mxu1 %vm1074_vm14, %v1193_v20 }
 0x2a9   : > { %2311 = vmatpush.xpose.msk.msra.mxu1 %vm1074_vm14, %v1447_v24 }
 0x2aa   : > { %v1445_v25 = vpop.permute.xlu1 %1444 }
 0x2ad   : > { %2312 = vmatpush.xpose.msk.msra.mxu1 %vm1074_vm14, %v1445_v25 }
 0x2af   : > { %v1317_v31 = vpop.permute.xlu0 %1316 }
 0x2b0   : > { %2307 = vmatmul.msk.f32.vlgmr.msra.gmra.mxu3 %vm1074_vm14, %v1317_v31  ;;  %2313 = vmatmul.msk.f32.vlgmr.msra.gmra.mxu1 %vm1074_vm14, %v1441_v27 }
 0x2b2   : > { %v1319_v32 = vpop.permute.xlu1 %1318 }
 0x2b7   : > { %v1443_v33 = vpop.permute.xlu0 %1442 }
 0x2b8   : > { %2308 = vmatmul.msk.f32.gmra.mxu3 %vm1074_vm14, %v1319_v32  ;;  %2314 = vmatmul.msk.f32.gmra.mxu1 %vm1074_vm14, %v1443_v33 }
 0x2b9   : > { %v1104_v35 = vpop.f32.mrf.mxu2 }
 0x2ba   : > { %v1110_v36 = vmul.f32 0.35355338, %v1104_v35 }
 0x2bc   : > { %v1113_v38 = vsel %vm1112_vm15, %v1110_v36, -inf }
 0x2bd   : > { %1114 = vmax.xlane.f32.xlu1 %v1113_v38 }
 0x2c2   : > { %v1107_v42 = vpop.f32.mrf.mxu2 }
 0x2c3   : > { %v1111_v46 = vmul.f32 0.35355338, %v1107_v42 }
 0x2c5   : > { %v1116_v2 = vsel %vm1112_vm15, %v1111_v46, -inf }
 0x31d   : > { %v1223_v26 = vpop.f32.mrf.mxu1 }
 0x31e   : > { %v1229_v39 = vmul.f32 0.35355338, %v1223_v26 }
 0x320   : > { %v1231_v41 = vsel %vm1112_vm15, %v1229_v39, -inf }
 0x321   : > { %1232 = vmax.xlane.f32.xlu2 %v1231_v41 }
 0x325   : > { %v1226_v45 = vpop.f32.mrf.mxu1 }
 0x326   : > { %v1230_v48 = vmul.f32 0.35355338, %v1226_v45 }
 0x328   : > { %v1234_v49 = vsel %vm1112_vm15, %v1230_v48, -inf }
 0x329   : > { %1117 = vmax.xlane.f32.xlu2 %v1116_v2  ;;  %1235 = vmax.xlane.f32.xlu0 %v1234_v49  ;;  %v2395_v2 = vpack.i.bf16 %v2860_v23, %v2862_v59 }
 0x32d   : > { %v1473_v50 = vpop.f32.mrf.mxu1 }
 0x32e   : > { %v1479_v51 = vmul.f32 0.35355338, %v1473_v50 }
 0x330   : > { %v1481_v34 = vsel %vm1112_vm15, %v1479_v51, -inf  ;;  %v1115_v53 = vpop.xlane.xlu1 %1114 }
 0x331   : > { %1482 = vmax.xlane.f32.xlu1 %v1481_v34  ;;  %v1119_v54 = vsub.f32 %v1110_v36, %v1115_v53 }
 0x333   : > { %v1349_v40 = vpop.f32.mrf.mxu3  ;;  %v1121_v3 = vmul.f32 1.442695, %v1119_v54 }
 0x334   : > { %v1355_v52 = vmul.f32 0.35355338, %v1349_v40 }
 0x335   : > { %v1476_v7 = vpop.f32.mrf.mxu1  ;;  %2425 = vpow2.f32 %v1121_v3 }
 0x336   : > { %v1480_v55 = vmul.f32 0.35355338, %v1476_v7  ;;  %v1357_v56 = vsel %vm1112_vm15, %v1355_v52, -inf }
 0x337   : > { %1358 = vmax.xlane.f32.xlu0 %v1357_v56 }
 0x338   : > { %v1484_v57 = vsel %vm1112_vm15, %v1480_v55, -inf }
 0x339   : > { %1485 = vmax.xlane.f32.xlu2 %v1484_v57 }
 0x33b   : > { %v1352_v8 = vpop.f32.mrf.mxu3  ;;  %v2913_v9 = vpop.eup %2425 }
 0x33c   : > { %v1356_v58 = vmul.f32 0.35355338, %v1352_v8  ;;  %v1125_v15 = vsel %vm1112_vm15, %v2913_v9, 0.0 }
 0x33e   : > { %v1360_v14 = vsel %vm1112_vm15, %v1356_v58, -inf }
 0x33f   : > { %1361 = vmax.xlane.f32.xlu1 %v1360_v14 }
 0x341   : > { %1126 = vadd.xlane.f32.xlu2 %v1125_v15 }
 0x394   : > { %v1233_v47 = vpop.xlane.xlu2 %1232 }
 0x395   : > { %v1237_v28 = vsub.f32 %v1229_v39, %v1233_v47 }
 0x397   : > { %v1239_v63 = vmul.f32 1.442695, %v1237_v28 }
 0x39c   : > { %v1118_v0 = vpop.xlane.xlu2 %1117  ;;  %v1236_v16 = vpop.xlane.xlu0 %1235 }
 0x39d   : > { %v1120_v22 = vsub.f32 %v1111_v46, %v1118_v0  ;;  %v1238_v60 = vsub.f32 %v1230_v48, %v1236_v16 }
 0x39f   : > { %v1123_v61 = vmul.f32 1.442695, %v1120_v22  ;;  %v1241_v62 = vmul.f32 1.442695, %v1238_v60 }
 0x3a1   : > { %2427 = vpow2.f32 %v1123_v61 }
 0x3a2   : > { %2429 = vpow2.f32 %v1241_v62 }
 0x3a3   : > { %2431 = vpow2.f32 %v1239_v63 }
 0x3a4   : > { %v1483_v29 = vpop.xlane.xlu1 %1482 }
 0x3a5   : > { %v1487_v4 = vsub.f32 %v1479_v51, %v1483_v29 }
 0x3a7   : > { %v2918_v30 = vpop.eup %2427  ;;  %v1489_v5 = vmul.f32 1.442695, %v1487_v4 }
 0x3a8   : > { %v2920_v6 = vpop.eup %2429  ;;  %v1128_v37 = vsel %vm1112_vm15, %v2918_v30, 0.0 }
 0x3a9   : > { %2433 = vpow2.f32 %v1489_v5  ;;  %1129 = vadd.xlane.f32.xlu0 %v1128_v37  ;;  %v1246_v10 = vsel %vm1112_vm15, %v2920_v6, 0.0  ;;  %v2926_v1 = vpop.eup %2431 }
 0x3aa   : > { %1247 = vadd.xlane.f32.xlu1 %v1246_v10  ;;  %v1359_v11 = vpop.xlane.xlu0 %1358  ;;  %v1243_v19 = vsel %vm1112_vm15, %v2926_v1, 0.0 }
 0x3ab   : > { %v1363_v43 = vsub.f32 %v1355_v52, %v1359_v11 }
 0x3ac   : > { %v1486_v12 = vpop.xlane.xlu2 %1485 }
 0x3ad   : > { %v1365_v44 = vmul.f32 1.442695, %v1363_v43  ;;  %v1488_v13 = vsub.f32 %v1480_v55, %v1486_v12 }
 0x3af   : > { %v2928_v17 = vpop.eup %2433  ;;  %2435 = vpow2.f32 %v1365_v44  ;;  %v1491_v18 = vmul.f32 1.442695, %v1488_v13 }
 0x3b0   : > { %v1493_v20 = vsel %vm1112_vm15, %v2928_v17, 0.0 }
 0x3b1   : > { %2437 = vpow2.f32 %v1491_v18  ;;  %1244 = vadd.xlane.f32.xlu0 %v1243_v19  ;;  %1494 = vadd.xlane.f32.xlu2 %v1493_v20 }
 0x3b2   : > { %v1362_v24 = vpop.xlane.xlu1 %1361 }
 0x3b3   : > { %v1364_v25 = vsub.f32 %v1356_v58, %v1362_v24 }
 0x3b4   : > { %v1127_v27 = vpop.xlane.xlu2 %1126 }
 0x3b5   : > { %v2934_v31 = vpop.eup %2435  ;;  %v1367_v32 = vmul.f32 1.442695, %v1364_v25  ;;  %2439 = vrcp.f32 %v1127_v27  ;;  %v1142_v42 = vand.u32 2147483648, %v1127_v27  ;;  %v1140_v45 = vand.u32 2147483647, %v1127_v27 }
 0x3b6   : > { %v1369_v35 = vsel %vm1112_vm15, %v2934_v31, 0.0  ;;  %vm1136_vm2 = vweird.f32 %v1127_v27 }
 0x3b7   : > { %v2936_v33 = vpop.eup %2437  ;;  %2441 = vpow2.f32 %v1367_v32  ;;  %v1143_v50 = vor.u32 1.1754944e-38, %v1142_v42  ;;  %vm1141_vm4 = vcmp.eq.f32.partialorder %v1140_v45, 8.507059e+37 }
 0x3b8   : > { %v1496_v36 = vsel %vm1112_vm15, %v2936_v33, 0.0 }
 0x3b9   : > { %1370 = vadd.xlane.f32.xlu0 %v1369_v35  ;;  %1497 = vadd.xlane.f32.xlu2 %v1496_v36 }
 0x3bb   : > { %v2440_v38 = vpop.eup %2439 }
 0x3bc   : > { %v1132_v26 = vmul.f32 %v2440_v38, %v1127_v27  ;;  %vm1137_vm1 = vweird.f32 %v2440_v38 }
 0x3bd   : > { %v2942_v39 = vpop.eup %2441  ;;  %vm1138_vm3 = vmor %vm1136_vm2, %vm1137_vm1 }
 0x3be   : > { %v1133_v41 = vsub.f32 1.0, %v1132_v26  ;;  %v1372_v48 = vsel %vm1112_vm15, %v2942_v39, 0.0 }
 0x3c0   : > { %v1134_v46 = vmul.f32 %v2440_v38, %v1133_v41 }
 0x3c1   : > { %1373 = vadd.xlane.f32.xlu0 %v1372_v48 }
 0x3c2   : > { %v1135_v49 = vadd.f32 %v2440_v38, %v1134_v46 }
 0x3c3   : > { %2396 = vrot.lane.b32.xlu1 %v2395_v2, %s2472_s24 }
 0x3c4   : > { %v1139_v51 = vsel %vm1138_vm3, %v2440_v38, %v1135_v49 }
 0x3c5   : > { %v1144_v34 = vsel %vm1141_vm4, %v1143_v50, %v1139_v51 }
 0x3c6   : > { %v1145_v53 = vmul.f32 %v2913_v9, %v1144_v34 }
 0x3c8   : > { %2297 = vmatmul.msk.f32.vlgmr.msrb.gmra.mxu0 %vm1112_vm15, %v1145_v53 }
 0x3d1   : > { %2401 = vrot.lane.b32.xlu2 %v2395_v2, %s2474_s20  ;;  %s2371_s20 = sshll.u32 %s3313_s30, 6 }
 0x3d2   : > { %s642_s27 = scalar_lea.vmem %s3302_s19, %s2371_s20 }
 0x3d5   : > { %2406 = vrot.lane.b32.xlu0 %v2395_v2, %s2473_s28 }
 0x41c   : > { %v1130_v54 = vpop.xlane.xlu0 %1129 }
 0x41d   : > { %2443 = vrcp.f32 %v1130_v54  ;;  %v2953_v23 = vpop.xlane.xlu1 %1247  ;;  %v1157_v57 = vand.u32 2147483648, %v1130_v54  ;;  %vm1151_vm6 = vweird.f32 %v1130_v54  ;;  %v1155_v9 = vand.u32 2147483647, %v1130_v54 }
 0x41e   : > { %2445 = vrcp.f32 %v2953_v23  ;;  %v1275_v35 = vand.u32 2147483648, %v2953_v23  ;;  %vm1269_vm1 = vweird.f32 %v2953_v23  ;;  %v1273_v41 = vand.u32 2147483647, %v2953_v23 }
 0x41f   : > { %v1158_v16 = vor.u32 1.1754944e-38, %v1157_v57  ;;  %vm1156_vm8 = vcmp.eq.f32.partialorder %v1155_v9, 8.507059e+37 }
 0x420   : > { %v1276_v49 = vor.u32 1.1754944e-38, %v1275_v35  ;;  %vm1274_vm3 = vcmp.eq.f32.partialorder %v1273_v41, 8.507059e+37 }
 0x423   : > { %v2444_v59 = vpop.eup %2443 }
 0x424   : > { %v1147_v40 = vmul.f32 %v2444_v59, %v1130_v54  ;;  %v1245_v52 = vpop.xlane.xlu0 %1244  ;;  %v2956_v3 = vpop.xlane.xlu2 %1494  ;;  %vm1152_vm5 = vweird.f32 %v2444_v59 }
 0x425   : > { %2447 = vrcp.f32 %v1245_v52  ;;  %v2958_v56 = vpop.eup %2445  ;;  %vm1153_vm7 = vmor %vm1151_vm6, %vm1152_vm5  ;;  %v1260_v4 = vand.u32 2147483648, %v1245_v52  ;;  %vm1254_vm10 = vweird.f32 %v1245_v52  ;;  %v1258_v37 = vand.u32 2147483647, %v1245_v52 }
 0x426   : > { %v1148_v7 = vsub.f32 1.0, %v1147_v40  ;;  %2449 = vrcp.f32 %v2956_v3  ;;  %v1265_v14 = vmul.f32 %v2958_v56, %v2953_v23  ;;  %vm1270_vm13 = vweird.f32 %v2958_v56 }
 0x427   : > { %v1261_v44 = vor.u32 1.1754944e-38, %v1260_v4  ;;  %vm1259_vm12 = vcmp.eq.f32.partialorder %v1258_v37, 8.507059e+37  ;;  %vm1271_vm2 = vmor %vm1269_vm1, %vm1270_vm13  ;;  %v1510_v23 = vand.u32 2147483648, %v2956_v3  ;;  %vm1504_vm6 = vweird.f32 %v2956_v3 }
 0x428   : > { %v1149_v55 = vmul.f32 %v2444_v59, %v1148_v7  ;;  %v1266_v61 = vsub.f32 1.0, %v1265_v14 }
 0x429   : > { %v1511_v9 = vor.u32 1.1754944e-38, %v1510_v23 }
 0x42a   : > { %v1150_v8 = vadd.f32 %v2444_v59, %v1149_v55  ;;  %v1267_v11 = vmul.f32 %v2958_v56, %v1266_v61 }
 0x42b   : > { %v2448_v58 = vpop.eup %2447 }
 0x42c   : > { %v1250_v15 = vmul.f32 %v2448_v58, %v1245_v52  ;;  %v2963_v47 = vpop.xlane.xlu0 %1370  ;;  %v1154_v0 = vsel %vm1153_vm7, %v2444_v59, %v1150_v8  ;;  %v2966_v60 = vpop.xlane.xlu2 %1497  ;;  %vm1255_vm9 = vweird.f32 %v2448_v58  ;;  %v1268_v27 = vadd.f32 %v2958_v56, %v1267_v11 }
 0x42d   : > { %2451 = vrcp.f32 %v2963_v47  ;;  %v1159_v28 = vsel %vm1156_vm8, %v1158_v16, %v1154_v0  ;;  %v2969_v29 = vpop.eup %2449  ;;  %vm1256_vm11 = vmor %vm1254_vm10, %vm1255_vm9  ;;  %v1508_v52 = vand.u32 2147483647, %v2956_v3  ;;  %v1386_v7 = vand.u32 2147483648, %v2963_v47 }
 0x42e   : > { %v1251_v22 = vsub.f32 1.0, %v1250_v15  ;;  %v1160_v63 = vmul.f32 %v2918_v30, %v1159_v28  ;;  %2453 = vrcp.f32 %v2966_v60  ;;  %v1500_v12 = vmul.f32 %v2969_v29, %v2956_v3 }
 0x42f   : > { %v1272_v2 = vsel %vm1271_vm2, %v2958_v56, %v1268_v27  ;;  %vm1505_vm4 = vweird.f32 %v2969_v29  ;;  %vm1380_vm8 = vweird.f32 %v2963_v47  ;;  %v1384_v56 = vand.u32 2147483647, %v2963_v47 }
 0x430   : > { %v1252_v62 = vmul.f32 %v2448_v58, %v1251_v22  ;;  %2298 = vmatmul.msk.f32.gmra.mxu0 %vm1112_vm15, %v1160_v63  ;;  %v1501_v24 = vsub.f32 1.0, %v1500_v12  ;;  %v1277_v34 = vsel %vm1274_vm3, %v1276_v49, %v1272_v2  ;;  %vm1506_vm7 = vmor %vm1504_vm6, %vm1505_vm4  ;;  %vm1509_vm10 = vcmp.eq.f32.partialorder %v1508_v52, 8.507059e+37  ;;  %v1604_v2 = vld [vmem:[%s3298_s15 + $0x8] sm:$0xff]  ;;  %v1605_v49 = vld [vmem:[%s3298_s15 + $0x10] sm:$0xff] }
 0x431   : > { %v1278_v55 = vmul.f32 %v2920_v6, %v1277_v34  ;;  %v1387_v14 = vor.u32 1.1754944e-38, %v1386_v7  ;;  %vm1519_vm13 = vweird.f32 %v2966_v60  ;;  %v1525_v22 = vand.u32 2147483648, %v2966_v60  ;;  %v1607_v52 = vld [vmem:[%s3298_s15 + $0x20] sm:$0xff] }
 0x432   : > { %v1253_v5 = vadd.f32 %v2448_v58, %v1252_v62  ;;  %v1502_v45 = vmul.f32 %v2969_v29, %v1501_v24  ;;  %v1682_v7 = vld [vmem:[%s3297_s14] sm:$0xff] }
 0x433   : > { %v2972_v10 = vpop.eup %2451 }
 0x434   : > { %v1257_v43 = vsel %vm1256_vm11, %v2448_v58, %v1253_v5  ;;  %v2978_v30 = vpop.xlane.xlu0 %1373  ;;  %v1376_v13 = vmul.f32 %v2972_v10, %v2963_v47  ;;  %v2402_v25 = vpop.permute.xlu2 %2401  ;;  %v1503_v53 = vadd.f32 %v2969_v29, %v1502_v45  ;;  %vm1381_vm5 = vweird.f32 %v2972_v10 }
 0x435   : > { %2455 = vrcp.f32 %v2978_v30  ;;  %v2397_v18 = vpop.permute.xlu1 %2396  ;;  %v1262_v19 = vsel %vm1259_vm12, %v1261_v44, %v1257_v43  ;;  %v2985_v32 = vpop.eup %2453  ;;  %v2403_v46 = vunpack.i.l.bf16 %v2402_v25  ;;  %v2404_v51 = vunpack.i.h.bf16 %v2402_v25  ;;  %vm1382_vm9 = vmor %vm1380_vm8, %vm1381_vm5 }
 0x436   : > { %v2398_v20 = vunpack.i.l.bf16 %v2397_v18  ;;  %v1377_v36 = vsub.f32 1.0, %v1376_v13  ;;  %v2399_v38 = vunpack.i.h.bf16 %v2397_v18  ;;  %v1263_v26 = vmul.f32 %v2926_v1, %v1262_v19 }
 0x437   : > { %v1515_v48 = vmul.f32 %v2985_v32, %v2966_v60  ;;  %v1507_v57 = vsel %vm1506_vm7, %v2969_v29, %v1503_v53  ;;  %vm1385_vm11 = vcmp.eq.f32.partialorder %v1384_v56, 8.507059e+37  ;;  %vm1520_vm12 = vweird.f32 %v2985_v32  ;;  %v1693_v56 = vld [vmem:[%s3296_s13 + $0x18] sm:$0xff] }
 0x438   : > { %1307 = vmatpush.msrb.mxu2 %v2398_v20  ;;  %v1378_v50 = vmul.f32 %v2972_v10, %v1377_v36  ;;  %v1512_v6 = vsel %vm1509_vm10, %v1511_v9, %v1507_v57  ;;  %v1401_v61 = vand.u32 2147483648, %v2978_v30  ;;  %v1523_v29 = vand.u32 2147483647, %v2966_v60  ;;  %vm1521_vm3 = vmor %vm1519_vm13, %vm1520_vm12  ;;  %1773 = vmatpush.msrb.mxu1 %v1693_v56  ;;  %v1608_v57 = vld [vmem:[%s3298_s15 + $0x28] sm:$0xff]  ;;  %v1610_v9 = vld [vmem:[%s3298_s15 + $0x38] sm:$0xff] }
 0x439   : > { %v1516_v54 = vsub.f32 1.0, %v1515_v48  ;;  %v1513_v63 = vmul.f32 %v2928_v17, %v1512_v6  ;;  %vm1395_vm2 = vweird.f32 %v2978_v30  ;;  %v1399_v5 = vand.u32 2147483647, %v2978_v30  ;;  %v1603_v48 = vld [vmem:[%s3298_s15] sm:$0xff]  ;;  %v1684_v6 = vld [vmem:[%s3297_s14 + $0x10] sm:$0xff] }
 0x43a   : > { %1308 = vmatpush.msrb.mxu2 %v2399_v38  ;;  %v1379_v59 = vadd.f32 %v2972_v10, %v1378_v50  ;;  %v1402_v11 = vor.u32 1.1754944e-38, %v1401_v61  ;;  %vm1524_vm5 = vcmp.eq.f32.partialorder %v1523_v29, 8.507059e+37  ;;  %vm1592_vm7 = vcmask 195584   ;;  %v1606_v50 = vld [vmem:[%s3298_s15 + $0x18] sm:$0xff] }
 0x43b   : > { %v2991_v42 = vpop.eup %2455  ;;  %2303 = vmatmul.msk.f32.vlgmr.msrb.gmra.mxu2 %vm1112_vm15, %v1263_v26  ;;  %v1517_v8 = vmul.f32 %v2985_v32, %v1516_v54  ;;  %vm1400_vm6 = vcmp.eq.f32.partialorder %v1399_v5, 8.507059e+37 }
 0x43c   : > { %v1391_v1 = vmul.f32 %v2991_v42, %v2978_v30  ;;  %1555 = vmatpush.msra.mxu2 %v2403_v46  ;;  %v1383_v58 = vsel %vm1382_vm9, %v2972_v10, %v1379_v59  ;;  %vm1396_vm1 = vweird.f32 %v2991_v42  ;;  %v1526_v10 = vor.u32 1.1754944e-38, %v1525_v22 }
 0x43d   : > { %v1388_v0 = vsel %vm1385_vm11, %v1387_v14, %v1383_v58  ;;  %v1518_v47 = vadd.f32 %v2985_v32, %v1517_v8  ;;  %vm1397_vm4 = vmor %vm1395_vm2, %vm1396_vm1  ;;  %v1609_v8 = vld [vmem:[%s3298_s15 + $0x30] sm:$0xff]  ;;  %v1690_v58 = vld [vmem:[%s3296_s13] sm:$0xff] }
 0x43e   : > { %1556 = vmatpush.msra.mxu2 %v2404_v51  ;;  %v1392_v40 = vsub.f32 1.0, %v1391_v1  ;;  %v1389_v4 = vmul.f32 %v2934_v31, %v1388_v0  ;;  %v1683_v14 = vld [vmem:[%s3297_s14 + $0x8] sm:$0xff]  ;;  %v1686_v0 = vld [vmem:[%s3297_s14 + $0x20] sm:$0xff] }
 0x43f   : > { %v1522_v37 = vsel %vm1521_vm3, %v2985_v32, %v1518_v47  ;;  %v1687_v47 = vld [vmem:[%s3297_s14 + $0x28] sm:$0xff] }
 0x440   : > { %v1393_v3 = vmul.f32 %v2991_v42, %v1392_v40  ;;  %v1527_v60 = vsel %vm1524_vm5, %v1526_v10, %v1522_v37 }
 0x441   : > { %v1528_v31 = vmul.f32 %v2936_v33, %v1527_v60 }
 0x442   : > { %v1394_v28 = vadd.f32 %v2991_v42, %v1393_v3  ;;  %v1691_v3 = vld [vmem:[%s3296_s13 + $0x8] sm:$0xff] }
 0x443   : > { %2304 = vmatmul.msk.f32.gmra.mxu2 %vm1112_vm15, %v1278_v55  ;;  %v1692_v55 = vld [vmem:[%s3296_s13 + $0x10] sm:$0xff]  ;;  %1774 = vmatpush.msrb.mxu1 %v1691_v3 }
 0x444   : > { %v1398_v17 = vsel %vm1397_vm4, %v2991_v42, %v1394_v28  ;;  %v1688_v28 = vld [vmem:[%s3297_s14 + $0x30] sm:$0xff] }
 0x445   : > { %v1403_v43 = vsel %vm1400_vm6, %v1402_v11, %v1398_v17  ;;  %v1184_v30 = vpop.f32.mrf.mxu0 }
 0x446   : > { %v1404_v12 = vmul.f32 %v2942_v39, %v1403_v43 }
 0x447   : > { %v2407_v15 = vpop.permute.xlu0 %2406 }
 0x448   : > { %v2408_v16 = vunpack.i.l.bf16 %v2407_v15  ;;  %v2409_v62 = vunpack.i.h.bf16 %v2407_v15  ;;  %v1685_v15 = vld [vmem:[%s3297_s14 + $0x18] sm:$0xff] }
 0x44a   : > { %1431 = vmatpush.msra.mxu0 %v2408_v16 }
 0x44b   : > { %2315 = vmatmul.msk.f32.vlgmr.msra.gmra.mxu2 %vm1112_vm15, %v1513_v63 }
 0x44c   : > { %1432 = vmatpush.msra.mxu0 %v2409_v62  ;;  %v1689_v62 = vld [vmem:[%s3297_s14 + $0x38] sm:$0xff] }
 0x44d   : > { %2309 = vmatmul.msk.f32.vlgmr.msra.gmra.mxu0 %vm1112_vm15, %v1389_v4 }
 0x44e   : > { %1732 = vmatpush.msrb.mxu0 %v1692_v55 }
 0x450   : > { %1733 = vmatpush.msrb.mxu0 %v1690_v58 }
 0x453   : > { %2316 = vmatmul.msk.f32.gmra.mxu2 %vm1112_vm15, %v1528_v31 }
 0x455   : > { %2310 = vmatmul.msk.f32.gmra.mxu0 %vm1112_vm15, %v1404_v12 }
 0x4ad   : > { %v1187_v13 = vpop.f32.mrf.mxu0 }
 0x4be   : > { %v1310_v44 = vpop.f32.mrf.mxu2 }
 0x4bf   : > { %1566 = vrot.lane.b32.xlu0 %v1310_v44, %s2475_s2 }
 0x4c6   : > { %v1313_v18 = vpop.f32.mrf.mxu2 }
 0x4c7   : > { %1568 = vrot.lane.b32.xlu1 %v1313_v18, %s2475_s2 }
 0x4ca   : > { %v1434_v19 = vpop.f32.mrf.mxu0 }
 0x4ce   : > { %v1558_v20 = vpop.f32.mrf.mxu2 }
 0x4d2   : > { %v1437_v24 = vpop.f32.mrf.mxu0 }
 0x4d3   : > { %1576 = vrot.lane.b32.xlu1 %v1437_v24, %s2476_s29 }
 0x4d6   : > { %v1561_v25 = vpop.f32.mrf.mxu2 }
 0x4d7   : > { %1584 = vrot.lane.b32.xlu2 %v1561_v25, %s2477_s23 }
 0x4db   : > { %1574 = vrot.lane.b32.xlu1 %v1434_v19, %s2476_s29 }
 0x4df   : > { %1582 = vrot.lane.b32.xlu2 %v1558_v20, %s2477_s23  ;;  %s3311_s23 = sld [smem:[#allocation4_spill]] }
 0x4e5   : > { %s637_s24 = scalar_lea.vmem %s3311_s23, %s2371_s20 }
 0x4e6   : > { %v3065_v1 = vld [vmem:[%s637_s24 + $0x38] sm:$0xff]  ;;  %v3067_v51 = vld [vmem:[%s637_s24 + $0x30] sm:$0xff]  ;;  %v3069_v34 = vld [vmem:[%s637_s24 + $0x20] sm:$0xff] }
 0x4e7   : > { %1836 = vmatpush.msrb.mxu2 %v3067_v51  ;;  %v3073_v53 = vld [vmem:[%s637_s24 + $0x28] sm:$0xff]  ;;  %v3075_v54 = vld [vmem:[%s637_s24 + $0x10] sm:$0xff]  ;;  %v3077_v23 = vld [vmem:[%s637_s24 + $0x18] sm:$0xff] }
 0x4e8   : > { %v3081_v59 = vld [vmem:[%s637_s24] sm:$0xff]  ;;  %v3083_v40 = vld [vmem:[%s637_s24 + $0x8] sm:$0xff] }
 0x4e9   : > { %1837 = vmatpush.msrb.mxu2 %v3069_v34 }
 0x4eb   : > { %1838 = vmatpush.msrb.mxu2 %v3075_v54 }
 0x4ed   : > { %1839 = vmatpush.msrb.mxu2 %v3081_v59 }
 0x4ee   : > { %2343 = vmatmul.msk.f32.vlgmr.msrb.gmra.mxu2 %vm757_vm0, %v1682_v7 }
 0x4f6   : > { %2344 = vmatmul.msk.f32.gmra.mxu2 %vm757_vm0, %v1683_v14 }
 0x4fe   : > { %2345 = vmatmul.msk.f32.gmra.mxu2 %vm757_vm0, %v1684_v6 }
 0x506   : > { %2346 = vmatmul.msk.f32.gmra.mxu2 %vm757_vm0, %v1685_v15 }
 0x50e   : > { %2347 = vmatmul.msk.f32.gmra.mxu2 %vm757_vm0, %v1686_v0 }
 0x516   : > { %2348 = vmatmul.msk.f32.gmra.mxu2 %vm757_vm0, %v1687_v47 }
 0x51e   : > { %2349 = vmatmul.msk.f32.gmra.mxu2 %vm757_vm0, %v1688_v28 }
 0x526   : > { %2350 = vmatmul.msk.f32.gmra.mxu2 %vm757_vm0, %v1689_v62 }
 0x531   : > { %v1585_v39 = vpop.permute.xlu2 %1584  ;;  %v1567_v38 = vpop.permute.xlu0 %1566 }
 0x532   : > { %v1588_v26 = vsel %vm1074_vm14, %v1184_v30, %v1567_v38 }
 0x539   : > { %v1569_v33 = vpop.permute.xlu1 %1568  ;;  %v1583_v42 = vpop.permute.xlu2 %1582 }
 0x53a   : > { %v1589_v27 = vsel %vm1074_vm14, %v1187_v13, %v1569_v33 }
 0x545   : > { %v1577_v32 = vpop.permute.xlu1 %1576 }
 0x546   : > { %v1591_v35 = vsel %vm1112_vm15, %v1589_v27, %v1577_v32 }
 0x547   : > { %v1594_v36 = vsel %vm1592_vm7, %v1591_v35, %v1585_v39 }
 0x548   : > { %2317 = vmatpush.xpose.msk.msrb.mxu3 %vm757_vm0, %v1594_v36 }
 0x54d   : > { %v1575_v41 = vpop.permute.xlu1 %1574 }
 0x54e   : > { %v1590_v46 = vsel %vm1112_vm15, %v1588_v26, %v1575_v41 }
 0x54f   : > { %v1593_v45 = vsel %vm1592_vm7, %v1590_v46, %v1583_v42 }
 0x550   : > { %2318 = vmatpush.xpose.msk.msrb.mxu3 %vm757_vm0, %v1593_v45 }
 0x553   : > { %2319 = vmatmul.msk.f32.vlgmr.msrb.gmra.mxu3 %vm757_vm0, %v1603_v48 }
 0x554   : > { %1877 = vmatpush.msra.mxu3 %v3065_v1 }
 0x556   : > { %1878 = vmatpush.msra.mxu3 %v3073_v53 }
 0x558   : > { %1879 = vmatpush.msra.mxu3 %v3077_v23 }
 0x55a   : > { %1880 = vmatpush.msra.mxu3 %v3083_v40 }
 0x55b   : > { %2320 = vmatmul.msk.f32.gmra.mxu3 %vm757_vm0, %v1604_v2 }
 0x563   : > { %2321 = vmatmul.msk.f32.gmra.mxu3 %vm757_vm0, %v1605_v49 }
 0x56b   : > { %2322 = vmatmul.msk.f32.gmra.mxu3 %vm757_vm0, %v1606_v50 }
 0x571   : > { %v1841_v10 = vpop.f32.mrf.mxu2 }
 0x573   : > { %2323 = vmatmul.msk.f32.gmra.mxu3 %vm757_vm0, %v1607_v52 }
 0x579   : > { %v3173_v11 = vpop.f32.mrf.mxu2 }
 0x57b   : > { %2324 = vmatmul.msk.f32.gmra.mxu3 %vm757_vm0, %v1608_v57 }
 0x581   : > { %v1847_v44 = vpop.f32.mrf.mxu2 }
 0x583   : > { %2325 = vmatmul.msk.f32.gmra.mxu3 %vm757_vm0, %v1609_v8 }
 0x589   : > { %v1850_v20 = vpop.f32.mrf.mxu2 }
 0x58b   : > { %2326 = vmatmul.msk.f32.gmra.mxu3 %vm757_vm0, %v1610_v9 }
 0x591   : > { %v1853_v39 = vpop.f32.mrf.mxu2 }
 0x593   : > { %2351 = vmatmul.msk.f32.vlgmr.msra.gmra.mxu3 %vm757_vm0, %v1682_v7 }
 0x599   : > { %v1856_v26 = vpop.f32.mrf.mxu2 }
 0x59b   : > { %2352 = vmatmul.msk.f32.gmra.mxu3 %vm757_vm0, %v1683_v14 }
 0x5a1   : > { %v1859_v45 = vpop.f32.mrf.mxu2 }
 0x5a3   : > { %2353 = vmatmul.msk.f32.gmra.mxu3 %vm757_vm0, %v1684_v6 }
 0x5a9   : > { %v1862_v7 = vpop.f32.mrf.mxu2 }
 0x5ab   : > { %2354 = vmatmul.msk.f32.gmra.mxu3 %vm757_vm0, %v1685_v15 }
 0x5b3   : > { %2355 = vmatmul.msk.f32.gmra.mxu3 %vm757_vm0, %v1686_v0 }
 0x5bb   : > { %2356 = vmatmul.msk.f32.gmra.mxu3 %vm757_vm0, %v1687_v47 }
 0x5c3   : > { %2357 = vmatmul.msk.f32.gmra.mxu3 %vm757_vm0, %v1688_v28 }
 0x5cb   : > { %2358 = vmatmul.msk.f32.gmra.mxu3 %vm757_vm0, %v1689_v62 }
 0x5d6   : > { %v1658_v16 = vpop.f32.mrf.mxu3 }
 0x5d7   : > { %2327 = vmatmul.msk.f32.vlgmr.msrb.gmra.mxu0 %vm1112_vm15, %v1658_v16  ;;  %2335 = vmatmul.msk.f32.vlgmr.msrb.gmra.mxu1 %vm1112_vm15, %v1658_v16 }
 0x5de   : > { %v1661_v22 = vpop.f32.mrf.mxu3 }
 0x5df   : > { %2328 = vmatmul.msk.f32.gmra.mxu0 %vm1112_vm15, %v1661_v22  ;;  %2336 = vmatmul.msk.f32.gmra.mxu1 %vm1112_vm15, %v1661_v22 }
 0x5e6   : > { %v1664_v61 = vpop.f32.mrf.mxu3 }
 0x5e7   : > { %2329 = vmatmul.msk.f32.gmra.mxu0 %vm1112_vm15, %v1664_v61  ;;  %2337 = vmatmul.msk.f32.gmra.mxu1 %vm1112_vm15, %v1664_v61 }
 0x5ee   : > { %v1667_v63 = vpop.f32.mrf.mxu3 }
 0x5ef   : > { %2330 = vmatmul.msk.f32.gmra.mxu0 %vm1112_vm15, %v1667_v63  ;;  %2338 = vmatmul.msk.f32.gmra.mxu1 %vm1112_vm15, %v1667_v63 }
 0x5f6   : > { %v1670_v29 = vpop.f32.mrf.mxu3 }
 0x5f7   : > { %2331 = vmatmul.msk.f32.gmra.mxu0 %vm1112_vm15, %v1670_v29  ;;  %2339 = vmatmul.msk.f32.gmra.mxu1 %vm1112_vm15, %v1670_v29 }
 0x5fe   : > { %v1673_v4 = vpop.f32.mrf.mxu3 }
 0x5ff   : > { %2332 = vmatmul.msk.f32.gmra.mxu0 %vm1112_vm15, %v1673_v4  ;;  %2340 = vmatmul.msk.f32.gmra.mxu1 %vm1112_vm15, %v1673_v4 }
 0x606   : > { %v1676_v5 = vpop.f32.mrf.mxu3 }
 0x607   : > { %2333 = vmatmul.msk.f32.gmra.mxu0 %vm1112_vm15, %v1676_v5  ;;  %2341 = vmatmul.msk.f32.gmra.mxu1 %vm1112_vm15, %v1676_v5 }
 0x60e   : > { %v1679_v37 = vpop.f32.mrf.mxu3 }
 0x60f   : > { %2334 = vmatmul.msk.f32.gmra.mxu0 %vm1112_vm15, %v1679_v37  ;;  %2342 = vmatmul.msk.f32.gmra.mxu1 %vm1112_vm15, %v1679_v37 }
 0x616   : > { %v1882_v17 = vpop.f32.mrf.mxu3 }
 0x61e   : > { %v3175_v60 = vpop.f32.mrf.mxu3 }
 0x626   : > { %v1888_v13 = vpop.f32.mrf.mxu3 }
 0x62e   : > { %v1891_v24 = vpop.f32.mrf.mxu3 }
 0x636   : > { %v1894_v27 = vpop.f32.mrf.mxu3 }
 0x63e   : > { %v1897_v41 = vpop.f32.mrf.mxu3 }
 0x646   : > { %v1900_v48 = vpop.f32.mrf.mxu3 }
 0x64e   : > { %v1903_v55 = vpop.f32.mrf.mxu3 }
 0x654   : > { %v1735_v43 = vpop.f32.mrf.mxu0  ;;  %v1776_v31 = vpop.f32.mrf.mxu1 }
 0x655   : > { %v3177_v12 = vadd.f32 %v1841_v10, %v1735_v43  ;;  %v3179_v30 = vadd.f32 %v1882_v17, %v1776_v31 }
 0x657   : > { %vm1906_vm6 = vcmp.ge.f32.partialorder %v3177_v12, 0.0  ;;  %vm1907_vm7 = vcmp.ge.f32.partialorder %v3179_v30, 0.0 }
 0x65c   : > { %v1738_v18 = vpop.f32.mrf.mxu0  ;;  %v1779_v19 = vpop.f32.mrf.mxu1 }
 0x65d   : > { %v1845_v31 = vadd.f32 %v3173_v11, %v1738_v18 }
 0x65f   : > { %vm1908_vm4 = vcmp.ge.f32.partialorder %v1845_v31, 0.0 }
 0x664   : > { %v1741_v25 = vpop.f32.mrf.mxu0  ;;  %v1782_v33 = vpop.f32.mrf.mxu1 }
 0x665   : > { %v1848_v4 = vadd.f32 %v1847_v44, %v1741_v25  ;;  %v1889_v5 = vadd.f32 %v1888_v13, %v1782_v33 }
 0x667   : > { %v1926_v25 = vmul.f32 0.01, %v1848_v4  ;;  %v1927_v33 = vmul.f32 0.01, %v1889_v5  ;;  %vm1910_vm2 = vcmp.ge.f32.partialorder %v1848_v4, 0.0  ;;  %vm1911_vm3 = vcmp.ge.f32.partialorder %v1889_v5, 0.0 }
 0x66c   : > { %v1744_v32 = vpop.f32.mrf.mxu0  ;;  %v1785_v35 = vpop.f32.mrf.mxu1 }
 0x66d   : > { %v1851_v22 = vadd.f32 %v1850_v20, %v1744_v32  ;;  %v1892_v28 = vadd.f32 %v1891_v24, %v1785_v35  ;;  %v1886_v20 = vadd.f32 %v3175_v60, %v1779_v19  ;;  %v1924_v35 = vmul.f32 0.01, %v1845_v31  ;;  %v2116_v19 = vld [vmem:[%s3300_s17 + $0x8] sm:$0xff] }
 0x66f   : > { %v1928_v24 = vmul.f32 0.01, %v1851_v22  ;;  %vm1912_vm13 = vcmp.ge.f32.partialorder %v1851_v22, 0.0  ;;  %vm1913_vm1 = vcmp.ge.f32.partialorder %v1892_v28, 0.0  ;;  %v1925_v11 = vmul.f32 0.01, %v1886_v20 }
 0x670   : > { %vm1909_vm5 = vcmp.ge.f32.partialorder %v1886_v20, 0.0 }
 0x671   : > { %v1944_v60 = vsel %vm1912_vm13, %v1851_v22, %v1928_v24 }
 0x674   : > { %v1747_v36 = vpop.f32.mrf.mxu0  ;;  %v1788_v38 = vpop.f32.mrf.mxu1 }
 0x675   : > { %v1854_v14 = vadd.f32 %v1853_v39, %v1747_v36  ;;  %v1895_v6 = vadd.f32 %v1894_v27, %v1788_v38  ;;  %v1929_v39 = vmul.f32 0.01, %v1892_v28  ;;  %v2115_v36 = vld [vmem:[%s3300_s17] sm:$0xff]  ;;  %v1922_v38 = vmul.f32 0.01, %v3177_v12 }
 0x677   : > { %v1930_v37 = vmul.f32 0.01, %v1854_v14  ;;  %v1931_v10 = vmul.f32 0.01, %v1895_v6  ;;  %vm1914_vm11 = vcmp.ge.f32.partialorder %v1854_v14, 0.0  ;;  %vm1915_vm12 = vcmp.ge.f32.partialorder %v1895_v6, 0.0 }
 0x678   : > { %v1945_v18 = vsel %vm1913_vm1, %v1892_v28, %v1929_v39 }
 0x679   : > { %v1946_v27 = vsel %vm1914_vm11, %v1854_v14, %v1930_v37  ;;  %v1947_v32 = vsel %vm1915_vm12, %v1895_v6, %v1931_v10 }
 0x67c   : > { %v1750_v42 = vpop.f32.mrf.mxu0  ;;  %v1791_v46 = vpop.f32.mrf.mxu1 }
 0x67d   : > { %v1857_v8 = vadd.f32 %v1856_v26, %v1750_v42  ;;  %v1898_v9 = vadd.f32 %v1897_v41, %v1791_v46  ;;  %v1923_v26 = vmul.f32 0.01, %v3179_v30  ;;  %v1942_v41 = vsel %vm1910_vm2, %v1848_v4, %v1926_v25 }
 0x67e   : > { %v1943_v42 = vsel %vm1911_vm3, %v1889_v5, %v1927_v33  ;;  %v2478_v46 = vmov 0  }
 0x67f   : > { %v1932_v61 = vmul.f32 0.01, %v1857_v8  ;;  %v1933_v62 = vmul.f32 0.01, %v1898_v9  ;;  %vm1916_vm9 = vcmp.ge.f32.partialorder %v1857_v8, 0.0  ;;  %vm1917_vm10 = vcmp.ge.f32.partialorder %v1898_v9, 0.0  ;;  %2411 = vset.pattern.permute.xlu1 %v2478_v46  ;;  %2410 = vset.pattern.permute.xlu0 %v2478_v46 }
 0x680   : > { %2126 = vperm.xlu1 %2411, %v2116_v19   ;;  %2121 = vperm.xlu0 %2410, %v2115_v36  }
 0x681   : > { %v1948_v44 = vsel %vm1916_vm9, %v1857_v8, %v1932_v61  ;;  %v1949_v13 = vsel %vm1917_vm10, %v1898_v9, %v1933_v62  ;;  %2412 = vset.pattern.permute.xlu2 %v2478_v46  ;;  %v2150_v8 = vld [vmem:[%s3301_s18 + $0x18] sm:$0xff] }
 0x682   : > { %v1957_v9 = vld [vmem:[%s3299_s16 + $0x18] sm:$0xff] }
 0x684   : > { %v1753_v2 = vpop.f32.mrf.mxu0  ;;  %v1794_v49 = vpop.f32.mrf.mxu1 }
 0x685   : > { %v1860_v50 = vadd.f32 %v1859_v45, %v1753_v2  ;;  %v1901_v52 = vadd.f32 %v1900_v48, %v1794_v49  ;;  %v1940_v45 = vsel %vm1908_vm4, %v1845_v31, %v1924_v35  ;;  %v1941_v48 = vsel %vm1909_vm5, %v1886_v20, %v1925_v11  ;;  %v1954_v2 = vld [vmem:[%s3299_s16] sm:$0xff] }
 0x686   : > { %v1938_v49 = vsel %vm1906_vm6, %v3177_v12, %v1922_v38  ;;  %v2148_v12 = vld [vmem:[%s3301_s18 + $0x8] sm:$0xff] }
 0x687   : > { %v1934_v15 = vmul.f32 0.01, %v1860_v50  ;;  %v1935_v0 = vmul.f32 0.01, %v1901_v52  ;;  %vm1918_vm15 = vcmp.ge.f32.partialorder %v1860_v50, 0.0  ;;  %vm1919_vm8 = vcmp.ge.f32.partialorder %v1901_v52, 0.0 }
 0x688   : > { %2158 = vperm.xlu0 %2410, %v2148_v12  }
 0x689   : > { %v1950_v17 = vsel %vm1918_vm15, %v1860_v50, %v1934_v15  ;;  %v1951_v43 = vsel %vm1919_vm8, %v1901_v52, %v1935_v0  ;;  %v1939_v50 = vsel %vm1907_vm7, %v3179_v30, %v1923_v26  ;;  %v2117_v52 = vld [vmem:[%s3300_s17 + $0x10] sm:$0xff]  ;;  %v1955_v30 = vld [vmem:[%s3299_s16 + $0x8] sm:$0xff] }
 0x68a   : > { %2131 = vperm.xlu2 %2412, %v2117_v52  }
 0x68c   : > { %v1756_v56 = vpop.f32.mrf.mxu0  ;;  %v1797_v57 = vpop.f32.mrf.mxu1 }
 0x68d   : > { %v1863_v58 = vadd.f32 %v1862_v7, %v1756_v56  ;;  %v1904_v3 = vadd.f32 %v1903_v55, %v1797_v57  ;;  %v2118_v7 = vld [vmem:[%s3300_s17 + $0x18] sm:$0xff]  ;;  %v2147_v55 = vld [vmem:[%s3301_s18] sm:$0xff]  ;;  %v2149_v56 = vld [vmem:[%s3301_s18 + $0x10] sm:$0xff] }
 0x68e   : > { %2136 = vperm.xlu1 %2411, %v2118_v7   ;;  %v1956_v57 = vld [vmem:[%s3299_s16 + $0x10] sm:$0xff] }
 0x68f   : > { %vm1920_vm0 = vcmp.ge.f32.partialorder %v1863_v58, 0.0  ;;  %v1936_v16 = vmul.f32 0.01, %v1863_v58  ;;  %vm1921_vm14 = vcmp.ge.f32.partialorder %v1904_v3, 0.0  ;;  %v1937_v47 = vmul.f32 0.01, %v1904_v3 }
 0x691   : > { %v1952_v63 = vsel %vm1920_vm0, %v1863_v58, %v1936_v16  ;;  %v1953_v29 = vsel %vm1921_vm14, %v1904_v3, %v1937_v47  ;;  %vm1958_vm0 = vcmask 523264  }
 0x692   : > { %1979 = vmatpush.msra.mxu0 %v1952_v63  ;;  %2008 = vmatpush.msra.mxu1 %v1953_v29 }
 0x693   : > { %2153 = vperm.xlu2 %2412, %v2147_v55  }
 0x694   : > { %1980 = vmatpush.msra.mxu0 %v1950_v17  ;;  %2009 = vmatpush.msra.mxu1 %v1951_v43 }
 0x696   : > { %1981 = vmatpush.msra.mxu0 %v1948_v44  ;;  %2010 = vmatpush.msra.mxu1 %v1949_v13 }
 0x697   : > { %2163 = vperm.xlu1 %2411, %v2149_v56  }
 0x698   : > { %1982 = vmatpush.msra.mxu0 %v1946_v27  ;;  %2011 = vmatpush.msra.mxu1 %v1947_v32 }
 0x69a   : > { %1983 = vmatpush.msra.mxu0 %v1944_v60  ;;  %2012 = vmatpush.msra.mxu1 %v1945_v18 }
 0x69b   : > { %2168 = vperm.xlu2 %2412, %v2150_v8  }
 0x69c   : > { %1984 = vmatpush.msra.mxu0 %v1942_v41  ;;  %2013 = vmatpush.msra.mxu1 %v1943_v42 }
 0x69e   : > { %1985 = vmatpush.msra.mxu0 %v1940_v45  ;;  %2014 = vmatpush.msra.mxu1 %v1941_v48 }
 0x6a0   : > { %1986 = vmatpush.msra.mxu0 %v1938_v49  ;;  %2015 = vmatpush.msra.mxu1 %v1939_v50 }
 0x6a1   : > { %2359 = vmatmul.msk.f32.vlgmr.msra.gmra.mxu0 %vm1958_vm0, %v1954_v2  ;;  %2363 = vmatmul.msk.f32.vlgmr.msra.gmra.mxu1 %vm1958_vm0, %v1954_v2 }
 0x6a9   : > { %2360 = vmatmul.msk.f32.gmra.mxu0 %vm1958_vm0, %v1955_v30  ;;  %2364 = vmatmul.msk.f32.gmra.mxu1 %vm1958_vm0, %v1955_v30 }
 0x6b1   : > { %2361 = vmatmul.msk.f32.gmra.mxu0 %vm1958_vm0, %v1956_v57  ;;  %2365 = vmatmul.msk.f32.gmra.mxu1 %vm1958_vm0, %v1956_v57 }
 0x6b9   : > { %2362 = vmatmul.msk.f32.gmra.mxu0 %vm1958_vm0, %v1957_v9  ;;  %2366 = vmatmul.msk.f32.gmra.mxu1 %vm1958_vm0, %v1957_v9 }
 0x71e   : > { %v1988_v58 = vpop.f32.mrf.mxu0  ;;  %v2017_v3 = vpop.f32.mrf.mxu1 }
 0x726   : > { %v1991_v14 = vpop.f32.mrf.mxu0  ;;  %v2020_v6 = vpop.f32.mrf.mxu1 }
 0x727   : > { %v2029_v16 = vadd.f32 %v1991_v14, %v1988_v58  ;;  %v2038_v47 = vadd.f32 %v2020_v6, %v2017_v3 }
 0x72e   : > { %v1994_v15 = vpop.f32.mrf.mxu0  ;;  %v2023_v0 = vpop.f32.mrf.mxu1 }
 0x72f   : > { %v2030_v22 = vadd.f32 %v2029_v16, %v1994_v15  ;;  %v2039_v28 = vadd.f32 %v2038_v47, %v2023_v0 }
 0x736   : > { %v1997_v61 = vpop.f32.mrf.mxu0  ;;  %v2026_v62 = vpop.f32.mrf.mxu1 }
 0x737   : > { %v2031_v63 = vadd.f32 %v2030_v22, %v1997_v61  ;;  %v2040_v29 = vadd.f32 %v2039_v28, %v2026_v62 }
 0x739   : > { %v2032_v4 = vrot.slane %v2031_v63, 4  ;;  %v2041_v5 = vrot.slane %v2040_v29, 4 }
 0x73b   : > { %v2033_v37 = vadd.f32 %v2032_v4, %v2031_v63  ;;  %v2042_v10 = vadd.f32 %v2041_v5, %v2040_v29  ;;  %v2132_v63 = vpop.permute.xlu2 %2131 }
 0x73d   : > { %v2034_v17 = vrot.slane %v2033_v37, 2  ;;  %v2043_v43 = vrot.slane %v2042_v10, 2 }
 0x73f   : > { %v2035_v31 = vadd.f32 %v2034_v17, %v2033_v37  ;;  %v2044_v20 = vadd.f32 %v2043_v43, %v2042_v10 }
 0x741   : > { %v2036_v24 = vrot.slane %v2035_v31, 1  ;;  %v2045_v39 = vrot.slane %v2044_v20, 1 }
 0x743   : > { %v2037_v44 = vadd.f32 %v2036_v24, %v2035_v31  ;;  %v2046_v13 = vadd.f32 %v2045_v39, %v2044_v20  ;;  %v2122_v31 = vpop.permute.xlu0 %2121 }
 0x745   : > { %v2047_v25 = vmul.f32 %v2037_v44, %v2761_v21  ;;  %v2048_v33 = vmul.f32 %v2046_v13, %v2761_v21  ;;  %v2154_v44 = vpop.permute.xlu2 %2153 }
 0x747   : > { %v3235_v27 = vsub.f32 %v1988_v58, %v2047_v25  ;;  %v3237_v32 = vsub.f32 %v1991_v14, %v2047_v25  ;;  %v3239_v35 = vsub.f32 %v1994_v15, %v2047_v25  ;;  %v3241_v11 = vsub.f32 %v2017_v3, %v2048_v33 }
 0x748   : > { %v3243_v60 = vsub.f32 %v2020_v6, %v2048_v33  ;;  %v3245_v18 = vsub.f32 %v2023_v0, %v2048_v33  ;;  %v2055_v19 = vsub.f32 %v1997_v61, %v2047_v25  ;;  %v2056_v26 = vsub.f32 %v2026_v62, %v2048_v33  ;;  %v2127_v62 = vpop.permute.xlu1 %2126 }
 0x749   : > { %v2057_v36 = vmul.f32 %v3235_v27, %v3235_v27  ;;  %v2059_v38 = vmul.f32 %v3237_v32, %v3237_v32  ;;  %v2058_v41 = vmul.f32 %v3241_v11, %v3241_v11  ;;  %v2061_v46 = vmul.f32 %v3239_v35, %v3239_v35 }
 0x74a   : > { %v2060_v42 = vmul.f32 %v3243_v60, %v3243_v60  ;;  %v2062_v48 = vmul.f32 %v3245_v18, %v3245_v18  ;;  %v2063_v49 = vmul.f32 %v2055_v19, %v2055_v19  ;;  %v2064_v52 = vmul.f32 %v2056_v26, %v2056_v26 }
 0x74b   : > { %v2065_v45 = vadd.f32 %v2059_v38, %v2057_v36 }
 0x74c   : > { %v2074_v2 = vadd.f32 %v2060_v42, %v2058_v41 }
 0x74d   : > { %v2066_v50 = vadd.f32 %v2065_v45, %v2061_v46 }
 0x74e   : > { %v2075_v7 = vadd.f32 %v2074_v2, %v2062_v48 }
 0x74f   : > { %v2067_v12 = vadd.f32 %v2066_v50, %v2063_v49 }
 0x750   : > { %v2076_v30 = vadd.f32 %v2075_v7, %v2064_v52  ;;  %v2137_v20 = vpop.permute.xlu1 %2136 }
 0x751   : > { %v2068_v55 = vrot.slane %v2067_v12, 4 }
 0x752   : > { %v2077_v56 = vrot.slane %v2076_v30, 4 }
 0x753   : > { %v2069_v57 = vadd.f32 %v2068_v55, %v2067_v12 }
 0x754   : > { %v2078_v8 = vadd.f32 %v2077_v56, %v2076_v30 }
 0x755   : > { %v2070_v9 = vrot.slane %v2069_v57, 2 }
 0x756   : > { %v2079_v58 = vrot.slane %v2078_v8, 2 }
 0x757   : > { %v2071_v3 = vadd.f32 %v2070_v9, %v2069_v57 }
 0x758   : > { %v2080_v14 = vadd.f32 %v2079_v58, %v2078_v8  ;;  %v2164_v56 = vpop.permute.xlu1 %2163  ;;  %v2169_v8 = vpop.permute.xlu2 %2168 }
 0x759   : > { %v2072_v6 = vrot.slane %v2071_v3, 1 }
 0x75a   : > { %v2081_v15 = vrot.slane %v2080_v14, 1 }
 0x75b   : > { %v2073_v0 = vadd.f32 %v2072_v6, %v2071_v3 }
 0x75c   : > { %v2082_v16 = vadd.f32 %v2081_v15, %v2080_v14 }
 0x75d   : > { %v2083_v47 = vmul.f32 %v2073_v0, %v2761_v21 }
 0x75e   : > { %v2084_v22 = vmul.f32 %v2082_v16, %v2761_v21 }
 0x75f   : > { %v2085_v28 = vadd.f32 1e-05, %v2083_v47 }
 0x760   : > { %v2086_v61 = vadd.f32 1e-05, %v2084_v22 }
 0x761   : > { %2457 = vrsqrt.f32 %v2085_v28  ;;  %vm2093_vm8 = vweird.f32 %v2085_v28 }
 0x762   : > { %2459 = vrsqrt.f32 %v2086_v61  ;;  %vm2103_vm10 = vweird.f32 %v2086_v61 }
 0x767   : > { %v2458_v29 = vpop.eup %2457 }
 0x768   : > { %v2460_v4 = vpop.eup %2459  ;;  %v2088_v5 = vmul.f32 %v2458_v29, %v2085_v28  ;;  %vm2094_vm14 = vweird.f32 %v2458_v29 }
 0x769   : > { %v2098_v37 = vmul.f32 %v2460_v4, %v2086_v61  ;;  %vm2104_vm15 = vweird.f32 %v2460_v4  ;;  %vm2095_vm9 = vmor %vm2093_vm8, %vm2094_vm14 }
 0x76a   : > { %v2089_v10 = vmul.f32 %v2458_v29, %v2088_v5  ;;  %vm2105_vm11 = vmor %vm2103_vm10, %vm2104_vm15 }
 0x76b   : > { %v2099_v17 = vmul.f32 %v2460_v4, %v2098_v37 }
 0x76c   : > { %v2090_v43 = vmul.f32 0.5, %v2089_v10 }
 0x76d   : > { %v2100_v24 = vmul.f32 0.5, %v2099_v17 }
 0x76e   : > { %v2091_v39 = vsub.f32 1.5, %v2090_v43 }
 0x76f   : > { %v2101_v21 = vsub.f32 1.5, %v2100_v24 }
 0x770   : > { %v2092_v13 = vmul.f32 %v2458_v29, %v2091_v39 }
 0x771   : > { %v2102_v25 = vmul.f32 %v2460_v4, %v2101_v21 }
 0x772   : > { %v2096_v33 = vsel %vm2095_vm9, %v2458_v29, %v2092_v13 }
 0x773   : > { %v2113_v36 = vmul.f32 %v2096_v33, %v2055_v19  ;;  %v2106_v38 = vsel %vm2105_vm11, %v2460_v4, %v2102_v25  ;;  %v2109_v41 = vmul.f32 %v2096_v33, %v3237_v32  ;;  %v2111_v42 = vmul.f32 %v2096_v33, %v3239_v35  ;;  %v2159_v32 = vpop.permute.xlu0 %2158 }
 0x774   : > { %v2114_v46 = vmul.f32 %v2106_v38, %v2056_v26  ;;  %v2110_v45 = vmul.f32 %v2106_v38, %v3243_v60  ;;  %v2112_v48 = vmul.f32 %v2106_v38, %v3245_v18  ;;  %v2107_v2 = vmul.f32 %v2096_v33, %v3235_v27 }
 0x775   : > { %v2141_v49 = vmul.f32 %v2127_v62, %v2109_v41  ;;  %v2143_v50 = vmul.f32 %v2132_v63, %v2111_v42  ;;  %v2108_v52 = vmul.f32 %v2106_v38, %v3241_v11  ;;  %v2145_v7 = vmul.f32 %v2137_v20, %v2113_v36 }
 0x776   : > { %v2142_v12 = vmul.f32 %v2127_v62, %v2110_v45  ;;  %v2144_v19 = vmul.f32 %v2132_v63, %v2112_v48  ;;  %v2139_v30 = vmul.f32 %v2122_v31, %v2107_v2  ;;  %v2146_v55 = vmul.f32 %v2137_v20, %v2114_v46 }
 0x777   : > { %v2140_v35 = vmul.f32 %v2122_v31, %v2108_v52  ;;  %v2173_v26 = vadd.f32 %v2159_v32, %v2141_v49  ;;  %v2175_v57 = vadd.f32 %v2164_v56, %v2143_v50  ;;  %v2177_v58 = vadd.f32 %v2169_v8, %v2145_v7 }
 0x778   : > { %v2171_v27 = vadd.f32 %v2154_v44, %v2139_v30  ;;  %v2174_v60 = vadd.f32 %v2159_v32, %v2142_v12  ;;  %v2176_v18 = vadd.f32 %v2164_v56, %v2144_v19  ;;  %v2178_v6 = vadd.f32 %v2169_v8, %v2146_v55 }
 0x779   : > { %v2172_v11 = vadd.f32 %v2154_v44, %v2140_v35  ;;  %v2181_v9 = vadd.f32 %v2173_v26, %v3075_v54  ;;  %v2183_v0 = vadd.f32 %v2175_v57, %v3069_v34  ;;  %v2185_v47 = vadd.f32 %v2177_v58, %v3067_v51 }
 0x77a   : > { %v2179_v3 = vadd.f32 %v2171_v27, %v3081_v59  ;;  %v2182_v14 = vadd.f32 %v2174_v60, %v3077_v23  ;;  %v2184_v16 = vadd.f32 %v2176_v18, %v3073_v53  ;;  %v2186_v54 = vadd.f32 %v2178_v6, %v3065_v1 }
 0x77b   : > { %v2180_v15 = vadd.f32 %v2172_v11, %v3083_v40  ;;  %2189 = vst [vmem:[%s642_s27 + $0x10] sm:$0xff] %v2181_v9 }
 0x77c   : > { %2187 = vst [vmem:[%s642_s27] sm:$0xff] %v2179_v3 }
 0x77d   : > { %2188 = vst [vmem:[%s642_s27 + $0x8] sm:$0xff] %v2180_v15 }
 0x77e   : > { %2190 = vst [vmem:[%s642_s27 + $0x18] sm:$0xff] %v2182_v14 }
 0x77f   : > { %2191 = vst [vmem:[%s642_s27 + $0x20] sm:$0xff] %v2183_v0 }
 0x780   : > { %2192 = vst [vmem:[%s642_s27 + $0x28] sm:$0xff] %v2184_v16 }
 0x781   : > { %2193 = vst [vmem:[%s642_s27 + $0x30] sm:$0xff] %v2185_v47 }
 0x782   : > { %2194 = vst [vmem:[%s642_s27 + $0x38] sm:$0xff] %v2186_v54 }
 0x783 PF: > { %s29_s0 = sadd.s32 1, %s2467_s0  }
 0x784   : > { %p26_p4 = scmp.ge.s32.totalorder %s29_s0, 4  }
 0x786   :  { %28 = sbr.rel (!%p26_p4) target bundleno = 5 (0x5), region = 132 }

</bundles_post_ra>
